<compile_context>
chip_gen: v5e
topology: v5e:2x2
jax: 0.10.0
libtpu: 0.0.40
codegen_flags: <defaults>
</compile_context>

<pallas_src>
import functools
import math

import jax
import jax.numpy as jnp
from jax.experimental import pallas as pl
from jax.experimental.pallas import tpu as pltpu


# ------------------------------------------------------------------
# Parameter preprocessing (kernel_generation) -- plain-JAX glue.
# ------------------------------------------------------------------
def _dilate_kernel_integer(kernel, dilation):
    """Port of dilate_kernel for integer dilation (delta == 0 path, no grid_sample)."""
    # kernel: (out_channels, 2, C, kh, kw), dilation: positive integer
    d_in = dilation * dilation                       # ceil(d**2) for integer d
    C, kh, kw = kernel.shape[2], kernel.shape[3], kernel.shape[4]
    new_in = C + (C - 1) * d_in
    new_h = kh + (kh - 1) * dilation
    new_w = kw + (kw - 1) * dilation
    new = jnp.zeros(kernel.shape[:2] + (new_in, new_h, new_w), kernel.dtype)
    new = new.at[:, :, ::d_in + 1, ::dilation + 1, ::dilation + 1].set(kernel)
    return new[:, :, -C:]


def kernel_generation(combination_weights, weights, sout):
    """Returns {level: conv kernel of shape (out_channels, in_channels, kh, kw)}."""
    relaxed = jnp.einsum('nf,fabcde->nabcde', combination_weights, weights)
    c = sout // 2
    kernels = {}

    def _finalize(k5):
        # k5: (out, 2, C, kh, kw) -> transpose(1,2) -> reshape(out, in, kh, kw)
        k5 = jnp.transpose(k5, (0, 2, 1, 3, 4))
        return k5.reshape(k5.shape[0], -1, k5.shape[3], k5.shape[4])

    # center level: identity transform
    kernels[c] = _finalize(relaxed[c])

    # dilated levels with integer dilation (no grid_sample needed)
    for s in range(c + 1, sout):
        d = (s - c) / 2.0
        if d == int(d):
            kernels[s] = _finalize(_dilate_kernel_integer(relaxed[s], int(d)))
    # TODO(synk): shrink_kernel and fractional-dilation levels rely on
    # torch.nn.functional.grid_sample (trilinear resample); no clean Pallas/JAX
    # one-liner, so those levels are not generated here.
    return kernels


# ------------------------------------------------------------------
# Pallas kernel 1: conv2d ('same' padding) via im2col + BN partial stats
# ------------------------------------------------------------------
def _conv_stats_kernel(x_ref, w_ref, conv_ref, sum_ref, ssq_ref, xpad_ref, col_ref,
                       *, H, W, Cin, kH, kW, ph, pw):
    # ---- in-kernel 'same' zero padding into a VMEM scratch ----
    # (re-zeroed every grid step: the scratch persists across iterations and the
    #  batch axis may be sharded across cores, so a program_id==0 guard is unsafe;
    #  the pad region is tiny so this is essentially free.)
    xpad_ref[...] = jnp.zeros_like(xpad_ref)
    xpad_ref[ph:ph + H, pw:pw + W, :] = x_ref[0]

    # ---- build the im2col patch matrix once: (H*W, kH*kW*Cin) ----
    for dy in range(kH):
        for dx in range(kW):
            tap = dy * kW + dx
            col_ref[:, tap * Cin:(tap + 1) * Cin] = (
                xpad_ref[dy:dy + H, dx:dx + W, :].reshape(H * W, Cin))

    # ---- single MXU matmul: (H*W, K) @ (K, Cout_pad), f32 accumulate ----
    acc = jnp.dot(col_ref[...], w_ref[...], preferred_element_type=jnp.float32)
    conv_ref[0] = acc

    # ---- per-image partial sums for training-mode BatchNorm statistics ----
    sum_ref[0] = jnp.sum(acc, axis=0, keepdims=True)
    ssq_ref[0] = jnp.sum(acc * acc, axis=0, keepdims=True)


# ------------------------------------------------------------------
# Pallas kernel 2: BatchNorm affine (precomputed scale/shift) + ReLU
#                  + in-kernel transpose to NCHW-flat output (lane dim = H*W)
# ------------------------------------------------------------------
def _bn_relu_kernel(conv_ref, scale_ref, shift_ref, o_ref, *, Cout):
    y = conv_ref[0] * scale_ref[0] + shift_ref[0]        # (HW, Cout_pad)
    y = jnp.maximum(y, 0.0)
    # XLU transpose keeps the HBM store lane-dense (last dim = HW, mult of 128)
    o_ref[0] = jnp.transpose(y)[:Cout, :]                 # (Cout, HW)


def conv_bn_relu(x_nchw, w_oihw, gamma, beta, eps=1e-5):
    """x_nchw: (N, Cin, H, W); w_oihw: (Cout, Cin, kH, kW). Returns (N, Cout, H, W)."""
    N, Cin, H, W = x_nchw.shape
    Cout, _, kH, kW = w_oihw.shape
    ph, pw = (kH - 1) // 2, (kW - 1) // 2
    Hp, Wp = H + 2 * ph, W + 2 * pw
    HW = H * W
    K = kH * kW * Cin
    Cout_pad = ((Cout + 127) // 128) * 128            # lane-dense channel count

    # NCHW -> NHWC activations; weights OIHW -> (kH, kW, Cin, Cout) -> (K, Cout_pad)
    # NOTE: kept f32 (bf16 MXU inputs would be faster on v6e/v7x but break the
    # 1e-4 tolerance vs the f32 reference).
    x = jnp.transpose(x_nchw, (0, 2, 3, 1)).astype(jnp.float32)
    w = jnp.transpose(w_oihw, (2, 3, 1, 0)).reshape(K, Cout).astype(jnp.float32)
    w = jnp.pad(w, ((0, 0), (0, Cout_pad - Cout)))

    cparams = pltpu.CompilerParams(
        dimension_semantics=("parallel",),
        vmem_limit_bytes=32 * 1024 * 1024)

    conv, sums, ssqs = pl.pallas_call(
        functools.partial(_conv_stats_kernel,
                          H=H, W=W, Cin=Cin, kH=kH, kW=kW, ph=ph, pw=pw),
        out_shape=(jax.ShapeDtypeStruct((N, HW, Cout_pad), jnp.float32),
                   jax.ShapeDtypeStruct((N, 1, Cout_pad), jnp.float32),
                   jax.ShapeDtypeStruct((N, 1, Cout_pad), jnp.float32)),
        grid=(N,),
        in_specs=[
            pl.BlockSpec((1, H, W, Cin), lambda n: (n, 0, 0, 0)),
            pl.BlockSpec((K, Cout_pad), lambda n: (0, 0)),
        ],
        out_specs=(
            pl.BlockSpec((1, HW, Cout_pad), lambda n: (n, 0, 0)),
            pl.BlockSpec((1, 1, Cout_pad), lambda n: (n, 0, 0)),
            pl.BlockSpec((1, 1, Cout_pad), lambda n: (n, 0, 0)),
        ),
        scratch_shapes=[
            pltpu.VMEM((Hp, Wp, Cin), jnp.float32),    # zero-padded input
            pltpu.VMEM((HW, K), jnp.float32),          # im2col patch matrix
        ],
        compiler_params=cparams,
    )(x, w)

    # ---- global BN statistics (tiny per-channel vectors; plain XLA) ----
    count = float(N * HW)
    mean = jnp.sum(sums, axis=0).reshape(Cout_pad) / count
    var = jnp.sum(ssqs, axis=0).reshape(Cout_pad) / count - mean * mean
    var = jnp.maximum(var, 0.0)                        # guard tiny negative fp error
    inv = jax.lax.rsqrt(var + eps)
    g = jnp.pad(gamma.astype(jnp.float32), (0, Cout_pad - Cout), constant_values=1.0)
    b = jnp.pad(beta.astype(jnp.float32), (0, Cout_pad - Cout))
    scale = (g * inv).reshape(1, 1, Cout_pad)
    shift = (b - mean * g * inv).reshape(1, 1, Cout_pad)

    out = pl.pallas_call(
        functools.partial(_bn_relu_kernel, Cout=Cout),
        out_shape=jax.ShapeDtypeStruct((N, Cout, HW), jnp.float32),
        grid=(N,),
        in_specs=[
            pl.BlockSpec((1, HW, Cout_pad), lambda n: (n, 0, 0)),
            pl.BlockSpec((1, 1, Cout_pad), lambda n: (0, 0, 0)),
            pl.BlockSpec((1, 1, Cout_pad), lambda n: (0, 0, 0)),
        ],
        out_specs=pl.BlockSpec((1, Cout, HW), lambda n: (n, 0, 0)),
        compiler_params=cparams,
    )(conv, scale, shift)

    # output is already NCHW-ordered; trailing reshape is free (contiguous)
    return out.reshape(N, Cout, H, W)


def forward(x, kernel, gamma, beta, level):
    """Mirror of Relaxed_Scale_GroupConv2d.forward(xx, level)."""
    out = conv_bn_relu(x, kernel, gamma, beta)
    return out, level


# ------------------------------------------------------------------
# Pure-JAX reference for verification
# ------------------------------------------------------------------
def reference(x, w, gamma, beta, eps=1e-5):
    ph, pw = (w.shape[2] - 1) // 2, (w.shape[3] - 1) // 2
    conv = jax.lax.conv_general_dilated(
        x, w, window_strides=(1, 1), padding=[(ph, ph), (pw, pw)],
        dimension_numbers=('NCHW', 'OIHW', 'NCHW'))
    mean = conv.mean(axis=(0, 2, 3), keepdims=True)
    var = ((conv - mean) ** 2).mean(axis=(0, 2, 3), keepdims=True)
    y = (conv - mean) / jnp.sqrt(var + eps) * gamma.reshape(1, -1, 1, 1) \
        + beta.reshape(1, -1, 1, 1)
    return jnp.maximum(y, 0.0)


# ------------------------------------------------------------------
if __name__ == "__main__":
    key = jax.random.PRNGKey(0)
    kw_key, kx_key = jax.random.split(key)

    # module hyperparameters (small synthetic sizes)
    in_channels, out_channels, kernel_size = 4, 8, 3
    num_filters, sout = 4, 5
    N, H, W = 2, 16, 16

    # deterministic parameter init, matching __init__ / reset_parameters
    stdv = math.sqrt(1.0 / (kernel_size * kernel_size * in_channels))
    weights = jax.random.uniform(
        kw_key,
        (num_filters, out_channels, 2, in_channels // 2, kernel_size, kernel_size),
        minval=-stdv, maxval=stdv, dtype=jnp.float32)
    combination_weights = jnp.ones((sout, num_filters), jnp.float32) / num_filters
    bias = jnp.zeros((out_channels,), jnp.float32)       # unused in forward (matches PyTorch)
    gamma = jnp.ones((out_channels,), jnp.float32)        # BatchNorm2d default weight
    beta = jnp.zeros((out_channels,), jnp.float32)        # BatchNorm2d default bias

    kernels = kernel_generation(combination_weights, weights, sout)

    x = jax.random.normal(kx_key, (N, in_channels, H, W), jnp.float32)

    # center level (identity-transformed 3x3 kernel)
    level = sout // 2
    out, lvl = forward(x, kernels[level], gamma, beta, level)
    out = jax.block_until_ready(out)
    ref = reference(x, kernels[level], gamma, beta)
    assert out.shape == (N, out_channels, H, W)
    assert jnp.allclose(out, ref, atol=1e-4, rtol=1e-4), "mismatch at center level"

    # integer-dilated level (5x5 kernel)
    level_d = sout - 1
    out_d, _ = forward(x, kernels[level_d], gamma, beta, level_d)
    out_d = jax.block_until_ready(out_d)
    ref_d = reference(x, kernels[level_d], gamma, beta)
    assert jnp.allclose(out_d, ref_d, atol=1e-4, rtol=1e-4), "mismatch at dilated level"

    print("KERNEL_OK")
</pallas_src>

<mosaic_0001>
module attributes {stable_mosaic.version = 11 : i64} {
  func.func @_conv_stats_kernel(%arg0: i32, %arg1: memref<1x16x16x4xf32, #tpu.memory_space<vmem>>, %arg2: memref<36x128xf32, #tpu.memory_space<vmem>>, %arg3: memref<1x256x128xf32, #tpu.memory_space<vmem>>, %arg4: memref<1x1x128xf32, #tpu.memory_space<vmem>>, %arg5: memref<1x1x128xf32, #tpu.memory_space<vmem>>, %arg6: memref<18x18x4xf32, #tpu.memory_space<vmem>>, %arg7: memref<256x36xf32, #tpu.memory_space<vmem>>) attributes {dimension_semantics = [#tpu.dimension_semantics<parallel>], iteration_bounds = array<i64: 2>, scalar_prefetch = 0 : i64, scratch_operands = 2 : i64, tpu.core_type = #tpu.core_type<tc>, window_params = [{transform_indices = @transform_0, window_bounds = array<i64: 1, 16, 16, 4>}, {pipeline_mode = #tpu.pipeline_mode<synchronous>, transform_indices = @transform_1, window_bounds = array<i64: 36, 128>}, {transform_indices = @transform_2, window_bounds = array<i64: 1, 256, 128>}, {transform_indices = @transform_3, window_bounds = array<i64: 1, 1, 128>}, {transform_indices = @transform_4, window_bounds = array<i64: 1, 1, 128>}]} {
    %cst = arith.constant 0.000000e+00 : f32
    %0 = vector.broadcast %cst : f32 to vector<18x18x4xf32>
    %c0 = arith.constant 0 : index
    %c0_0 = arith.constant 0 : index
    %c0_1 = arith.constant 0 : index
    %1 = vector.load %arg6[%c0, %c0_0, %c0_1] : memref<18x18x4xf32, #tpu.memory_space<vmem>>, vector<18x18x4xf32>
    tpu.vector_store %arg6[%c0, %c0_0, %c0_1], %0 {strides = array<i32>} : memref<18x18x4xf32, #tpu.memory_space<vmem>>, vector<18x18x4xf32>,
    %c0_2 = arith.constant 0 : index
    %c0_3 = arith.constant 0 : index
    %c0_4 = arith.constant 0 : index
    %c0_5 = arith.constant 0 : index
    %2 = vector.load %arg1[%c0_2, %c0_3, %c0_4, %c0_5] : memref<1x16x16x4xf32, #tpu.memory_space<vmem>>, vector<1x16x16x4xf32>
    %3 = vector.shape_cast %2 : vector<1x16x16x4xf32> to vector<16x16x4xf32>
    %c1 = arith.constant 1 : index
    %c1_6 = arith.constant 1 : index
    %c0_7 = arith.constant 0 : index
    %4 = vector.load %arg6[%c1, %c1_6, %c0_7] : memref<18x18x4xf32, #tpu.memory_space<vmem>>, vector<16x16x4xf32>
    tpu.vector_store %arg6[%c1, %c1_6, %c0_7], %3 {strides = array<i32>} : memref<18x18x4xf32, #tpu.memory_space<vmem>>, vector<16x16x4xf32>,
    %c0_8 = arith.constant 0 : index
    %c0_9 = arith.constant 0 : index
    %c0_10 = arith.constant 0 : index
    %5 = vector.load %arg6[%c0_8, %c0_9, %c0_10] : memref<18x18x4xf32, #tpu.memory_space<vmem>>, vector<16x16x4xf32>
    %6 = vector.shape_cast %5 : vector<16x16x4xf32> to vector<256x4xf32>
    %c0_11 = arith.constant 0 : index
    %c0_12 = arith.constant 0 : index
    %7 = vector.load %arg7[%c0_11, %c0_12] : memref<256x36xf32, #tpu.memory_space<vmem>>, vector<256x4xf32>
    tpu.vector_store %arg7[%c0_11, %c0_12], %6 {strides = array<i32>} : memref<256x36xf32, #tpu.memory_space<vmem>>, vector<256x4xf32>,
    %c0_13 = arith.constant 0 : index
    %c1_14 = arith.constant 1 : index
    %c0_15 = arith.constant 0 : index
    %8 = vector.load %arg6[%c0_13, %c1_14, %c0_15] : memref<18x18x4xf32, #tpu.memory_space<vmem>>, vector<16x16x4xf32>
    %9 = vector.shape_cast %8 : vector<16x16x4xf32> to vector<256x4xf32>
    %c0_16 = arith.constant 0 : index
    %c4 = arith.constant 4 : index
    %10 = vector.load %arg7[%c0_16, %c4] : memref<256x36xf32, #tpu.memory_space<vmem>>, vector<256x4xf32>
    tpu.vector_store %arg7[%c0_16, %c4], %9 {strides = array<i32>} : memref<256x36xf32, #tpu.memory_space<vmem>>, vector<256x4xf32>,
    %c0_17 = arith.constant 0 : index
    %c2 = arith.constant 2 : index
    %c0_18 = arith.constant 0 : index
    %11 = vector.load %arg6[%c0_17, %c2, %c0_18] : memref<18x18x4xf32, #tpu.memory_space<vmem>>, vector<16x16x4xf32>
    %12 = vector.shape_cast %11 : vector<16x16x4xf32> to vector<256x4xf32>
    %c0_19 = arith.constant 0 : index
    %c8 = arith.constant 8 : index
    %13 = vector.load %arg7[%c0_19, %c8] : memref<256x36xf32, #tpu.memory_space<vmem>>, vector<256x4xf32>
    tpu.vector_store %arg7[%c0_19, %c8], %12 {strides = array<i32>} : memref<256x36xf32, #tpu.memory_space<vmem>>, vector<256x4xf32>,
    %c1_20 = arith.constant 1 : index
    %c0_21 = arith.constant 0 : index
    %c0_22 = arith.constant 0 : index
    %14 = vector.load %arg6[%c1_20, %c0_21, %c0_22] : memref<18x18x4xf32, #tpu.memory_space<vmem>>, vector<16x16x4xf32>
    %15 = vector.shape_cast %14 : vector<16x16x4xf32> to vector<256x4xf32>
    %c0_23 = arith.constant 0 : index
    %c12 = arith.constant 12 : index
    %16 = vector.load %arg7[%c0_23, %c12] : memref<256x36xf32, #tpu.memory_space<vmem>>, vector<256x4xf32>
    tpu.vector_store %arg7[%c0_23, %c12], %15 {strides = array<i32>} : memref<256x36xf32, #tpu.memory_space<vmem>>, vector<256x4xf32>,
    %c1_24 = arith.constant 1 : index
    %c1_25 = arith.constant 1 : index
    %c0_26 = arith.constant 0 : index
    %17 = vector.load %arg6[%c1_24, %c1_25, %c0_26] : memref<18x18x4xf32, #tpu.memory_space<vmem>>, vector<16x16x4xf32>
    %18 = vector.shape_cast %17 : vector<16x16x4xf32> to vector<256x4xf32>
    %c0_27 = arith.constant 0 : index
    %c16 = arith.constant 16 : index
    %19 = vector.load %arg7[%c0_27, %c16] : memref<256x36xf32, #tpu.memory_space<vmem>>, vector<256x4xf32>
    tpu.vector_store %arg7[%c0_27, %c16], %18 {strides = array<i32>} : memref<256x36xf32, #tpu.memory_space<vmem>>, vector<256x4xf32>,
    %c1_28 = arith.constant 1 : index
    %c2_29 = arith.constant 2 : index
    %c0_30 = arith.constant 0 : index
    %20 = vector.load %arg6[%c1_28, %c2_29, %c0_30] : memref<18x18x4xf32, #tpu.memory_space<vmem>>, vector<16x16x4xf32>
    %21 = vector.shape_cast %20 : vector<16x16x4xf32> to vector<256x4xf32>
    %c0_31 = arith.constant 0 : index
    %c20 = arith.constant 20 : index
    %22 = vector.load %arg7[%c0_31, %c20] : memref<256x36xf32, #tpu.memory_space<vmem>>, vector<256x4xf32>
    tpu.vector_store %arg7[%c0_31, %c20], %21 {strides = array<i32>} : memref<256x36xf32, #tpu.memory_space<vmem>>, vector<256x4xf32>,
    %c2_32 = arith.constant 2 : index
    %c0_33 = arith.constant 0 : index
    %c0_34 = arith.constant 0 : index
    %23 = vector.load %arg6[%c2_32, %c0_33, %c0_34] : memref<18x18x4xf32, #tpu.memory_space<vmem>>, vector<16x16x4xf32>
    %24 = vector.shape_cast %23 : vector<16x16x4xf32> to vector<256x4xf32>
    %c0_35 = arith.constant 0 : index
    %c24 = arith.constant 24 : index
    %25 = vector.load %arg7[%c0_35, %c24] : memref<256x36xf32, #tpu.memory_space<vmem>>, vector<256x4xf32>
    tpu.vector_store %arg7[%c0_35, %c24], %24 {strides = array<i32>} : memref<256x36xf32, #tpu.memory_space<vmem>>, vector<256x4xf32>,
    %c2_36 = arith.constant 2 : index
    %c1_37 = arith.constant 1 : index
    %c0_38 = arith.constant 0 : index
    %26 = vector.load %arg6[%c2_36, %c1_37, %c0_38] : memref<18x18x4xf32, #tpu.memory_space<vmem>>, vector<16x16x4xf32>
    %27 = vector.shape_cast %26 : vector<16x16x4xf32> to vector<256x4xf32>
    %c0_39 = arith.constant 0 : index
    %c28 = arith.constant 28 : index
    %28 = vector.load %arg7[%c0_39, %c28] : memref<256x36xf32, #tpu.memory_space<vmem>>, vector<256x4xf32>
    tpu.vector_store %arg7[%c0_39, %c28], %27 {strides = array<i32>} : memref<256x36xf32, #tpu.memory_space<vmem>>, vector<256x4xf32>,
    %c2_40 = arith.constant 2 : index
    %c2_41 = arith.constant 2 : index
    %c0_42 = arith.constant 0 : index
    %29 = vector.load %arg6[%c2_40, %c2_41, %c0_42] : memref<18x18x4xf32, #tpu.memory_space<vmem>>, vector<16x16x4xf32>
    %30 = vector.shape_cast %29 : vector<16x16x4xf32> to vector<256x4xf32>
    %c0_43 = arith.constant 0 : index
    %c32 = arith.constant 32 : index
    %31 = vector.load %arg7[%c0_43, %c32] : memref<256x36xf32, #tpu.memory_space<vmem>>, vector<256x4xf32>
    tpu.vector_store %arg7[%c0_43, %c32], %30 {strides = array<i32>} : memref<256x36xf32, #tpu.memory_space<vmem>>, vector<256x4xf32>,
    %c0_44 = arith.constant 0 : index
    %c0_45 = arith.constant 0 : index
    %32 = vector.load %arg7[%c0_44, %c0_45] : memref<256x36xf32, #tpu.memory_space<vmem>>, vector<256x36xf32>
    %c0_46 = arith.constant 0 : index
    %c0_47 = arith.constant 0 : index
    %33 = vector.load %arg2[%c0_46, %c0_47] : memref<36x128xf32, #tpu.memory_space<vmem>>, vector<36x128xf32>
    %cst_48 = arith.constant dense<0.000000e+00> : vector<256x128xf32>
    %34 = tpu.matmul %32, %33, %cst_48 {dimension_numbers = #tpu.dot_dimension_numbers<[1], [0], [0], [1], [0, 0, 1, 1], [], []>} : vector<256x36xf32>, vector<36x128xf32>, vector<256x128xf32> -> vector<256x128xf32>
    %c0_49 = arith.constant 0 : index
    %c0_50 = arith.constant 0 : index
    %c0_51 = arith.constant 0 : index
    %35 = vector.load %arg3[%c0_49, %c0_50, %c0_51] : memref<1x256x128xf32, #tpu.memory_space<vmem>>, vector<1x256x128xf32>
    %36 = vector.shape_cast %35 : vector<1x256x128xf32> to vector<256x128xf32>
    %37 = vector.shape_cast %34 : vector<256x128xf32> to vector<1x256x128xf32>
    tpu.vector_store %arg3[%c0_49, %c0_50, %c0_51], %37 {strides = array<i32>} : memref<1x256x128xf32, #tpu.memory_space<vmem>>, vector<1x256x128xf32>,
    %cst_52 = arith.constant dense<0.000000e+00> : vector<128xf32>
    %38 = vector.multi_reduction <add>, %34, %cst_52 [0] : vector<256x128xf32> to vector<128xf32>
    %39 = vector.shape_cast %38 : vector<128xf32> to vector<1x128xf32>
    %c0_53 = arith.constant 0 : index
    %c0_54 = arith.constant 0 : index
    %c0_55 = arith.constant 0 : index
    %40 = vector.load %arg4[%c0_53, %c0_54, %c0_55] : memref<1x1x128xf32, #tpu.memory_space<vmem>>, vector<1x1x128xf32>
    %41 = vector.shape_cast %40 : vector<1x1x128xf32> to vector<1x128xf32>
    %42 = vector.shape_cast %39 : vector<1x128xf32> to vector<1x1x128xf32>
    tpu.vector_store %arg4[%c0_53, %c0_54, %c0_55], %42 {strides = array<i32>} : memref<1x1x128xf32, #tpu.memory_space<vmem>>, vector<1x1x128xf32>,
    %43 = arith.mulf %34, %34 : vector<256x128xf32>
    %cst_56 = arith.constant dense<0.000000e+00> : vector<128xf32>
    %44 = vector.multi_reduction <add>, %43, %cst_56 [0] : vector<256x128xf32> to vector<128xf32>
    %45 = vector.shape_cast %44 : vector<128xf32> to vector<1x128xf32>
    %c0_57 = arith.constant 0 : index
    %c0_58 = arith.constant 0 : index
    %c0_59 = arith.constant 0 : index
    %46 = vector.load %arg5[%c0_57, %c0_58, %c0_59] : memref<1x1x128xf32, #tpu.memory_space<vmem>>, vector<1x1x128xf32>
    %47 = vector.shape_cast %46 : vector<1x1x128xf32> to vector<1x128xf32>
    %48 = vector.shape_cast %45 : vector<1x128xf32> to vector<1x1x128xf32>
    tpu.vector_store %arg5[%c0_57, %c0_58, %c0_59], %48 {strides = array<i32>} : memref<1x1x128xf32, #tpu.memory_space<vmem>>, vector<1x1x128xf32>,
    return
  }
  func.func @transform_0(%arg0: i32) -> (i32, i32, i32, i32) {
    %c0_i32 = arith.constant 0 : i32
    %c0_i32_0 = arith.constant 0 : i32
    %c0_i32_1 = arith.constant 0 : i32
    %c0_i32_2 = arith.constant 0 : i32
    return %arg0, %c0_i32, %c0_i32_0, %c0_i32_1 : i32, i32, i32, i32
  }
  func.func @transform_1(%arg0: i32) -> (i32, i32) {
    %c0_i32 = arith.constant 0 : i32
    %c0_i32_0 = arith.constant 0 : i32
    %c0_i32_1 = arith.constant 0 : i32
    return %c0_i32, %c0_i32_0 : i32, i32
  }
  func.func @transform_2(%arg0: i32) -> (i32, i32, i32) {
    %c0_i32 = arith.constant 0 : i32
    %c0_i32_0 = arith.constant 0 : i32
    %c0_i32_1 = arith.constant 0 : i32
    return %arg0, %c0_i32, %c0_i32_0 : i32, i32, i32
  }
  func.func @transform_3(%arg0: i32) -> (i32, i32, i32) {
    %c0_i32 = arith.constant 0 : i32
    %c0_i32_0 = arith.constant 0 : i32
    %c0_i32_1 = arith.constant 0 : i32
    return %arg0, %c0_i32, %c0_i32_0 : i32, i32, i32
  }
  func.func @transform_4(%arg0: i32) -> (i32, i32, i32) {
    %c0_i32 = arith.constant 0 : i32
    %c0_i32_0 = arith.constant 0 : i32
    %c0_i32_1 = arith.constant 0 : i32
    return %arg0, %c0_i32, %c0_i32_0 : i32, i32, i32
  }
}

</mosaic_0001>

<bundles_post_ra>
// kernel: tpu_custom_call.1
= control target key start
LH: loop header
LB: loop body
LE: loop exit
PB: predicated region body
PF: predicated region fallthrough
CT: control target
= control target key end

     0   :  { %10 = vsyncpa [#allocation5], 0  ;;  %s4140_s0 = inlined_call_operand.vmem [shape: f32[2,16,16,4], index: 0, kind: input, shape index: {}]   ;;  %s4141_s1 = inlined_call_operand.vmem [shape: f32[36,128], index: 1, kind: input, shape index: {}]   ;;  %s4142_s2 = inlined_call_operand.hbm [shape: f32[2,256,128], index: 2, kind: output, shape index: {0}]   ;;  %s4143_s3 = inlined_call_operand.hbm [shape: f32[2,1,128], index: 3, kind: output, shape index: {1}]   ;;  %s4144_s4 = inlined_call_operand.hbm [shape: f32[2,1,128], index: 4, kind: output, shape index: {2}]  }
   0x1   :  { %12 = vsyncpa [#allocation5 + $0x1], 0 }
   0x2   :  { %13 = vsyncpa [#allocation7], 0 }
   0x3   :  { %15 = vsyncpa [#allocation7 + $0x1], 0  ;;  %s2778_s15 = smov 0   ;;  %s2780_s16 = smov 0  }
   0x4   :  { %s2782_s17 = smov 0   ;;  %s2784_s18 = smov 0  }
   0x5 LB: > { %s2799_s19 = sadd.s32 4294967295, %s2741_s18   ;;  %s2498_s20 = sadd.s32 4294967294, %s2741_s18   ;;  %s2741_s18 = sphi %s2784_s18, %s4240_s18   ;;  %s2737_s17 = sphi %s2782_s17, %s4239_s17   ;;  %s2733_s16 = sphi %s2780_s16, %s4238_s16   ;;  %s2729_s15 = sphi %s2778_s15, %s4237_s15  }
   0x6   : > { %s2803_s21 = sadd.s32 1, %s2741_s18   ;;  %s75_s22 = sadd.s32 1, %s2737_s17 }
   0x7   : > { %s72_s23 = ssub.s32 %s2741_s18, %s2803_s21  ;;  %p85_p0 = scmp.ne.s32.totalorder %s2737_s17, %s2733_s16 }
   0x8   : > { %p73_p1 = scmp.eq.s32.totalorder %s72_s23, 0  ;;  %p86_p2 = scmp.eq.s32.totalorder %s2799_s19, 1 }
   0x9   : > { %p91_p3 = scmp.ne.s32.totalorder %s2733_s16, %s2729_s15  ;;  %p92_p4 = scmp.eq.s32.totalorder %s2498_s20, 1 }
   0xa   : > { %s2816_s24 = scalar_select %p73_p1, %s2737_s17, %s75_s22  }
   0xb   : > { %p2818_p5 = por %p86_p2, %p85_p0  ;;  %p2822_p6 = por %p92_p4, %p91_p3 }
   0xc   : > { %p2501_p7 = scmp.ge.s32.totalorder %s2741_s18, 1  ;;  %p173_p8 = scmp.lt.s32.totalorder %s2741_s18, 3 }
   0xe   : > { %p174_p9 = pnand %p2501_p7, %p173_p8 }
  0x10   : > { %177 = sbr.rel (%p174_p9) target bundleno = 1038 (0x40e), region = 28 }
  0x15   : > { %vm212_vm0 = vcmask 31744   ;;  %v2743_v0 = vmov 0.0   ;;  %s2744_s27 = smov 4   ;;  %p207_p10 = scmp.lt.s32.totalorder %s2799_s19, 1  ;;  %vm215_vm1 = vcmask 25600   ;;  %vm557_vm2 = vcmask 64544  }
  0x16   : > { %213 = vst.msk [vmem:[#allocation2] sm:$0xff] %vm212_vm0, %v2743_v0  ;;  %s2745_s7 = smov 8   ;;  %s2746_s8 = smov 12   ;;  %vm750_vm3 = vcmask 97344   ;;  %vm943_vm4 = vcmask 130144   ;;  %vm1136_vm5 = vcmask 162944  }
  0x17   : > { %214 = vst.msk [vmem:[#allocation2 + $0x8] sm:$0xff] %vm212_vm0, %v2743_v0  ;;  %s208_s28 = scalar_select %p207_p10, %s2799_s19, 1  ;;  %vm1329_vm6 = vcmask 195744   ;;  %vm2076_vm7 = vcmask 1043456   ;;  %vm1523_vm8 = vcmask 228544   ;;  %vm1716_vm9 = vcmask 261344  }
  0x18   : > { %217 = vst.msk [vmem:[#allocation2 + $0x18] sm:$0xff] %vm212_vm0, %v2743_v0  ;;  %s2747_s9 = smov 16   ;;  %s2748_s10 = smov 20   ;;  %vm1909_vm10 = vcmask 294144   ;;  %vm1979_vm11 = vcmask 293888  }
  0x19   : > { %218 = vst.msk [vmem:[#allocation2 + $0x20] sm:$0xff] %vm212_vm0, %v2743_v0  ;;  %s2543_s29 = sshll.u32 %s208_s28, 8  ;;  %s2749_s11 = smov 28  }
  0x1a   : > { %220 = vst.msk [vmem:[#allocation2 + $0x30] sm:$0xff] %vm212_vm0, %v2743_v0  ;;  %s2896_s6 = scalar_lea.vmem %s4140_s0, %s2543_s29  ;;  %s2750_s12 = smov 32  }
  0x1b   : > { %221 = vst.msk [vmem:[#allocation2 + $0x38] sm:$0xff] %vm212_vm0, %v2743_v0  ;;  %v268_v2 = vld [vmem:[%s2896_s6] sm:$0xff]  ;;  %v269_v5 = vld [vmem:[%s2896_s6 + $0x8] sm:$0xff]  ;;  %v270_v8 = vld [vmem:[%s2896_s6 + $0x10] sm:$0xff]  ;;  %s2751_s13 = smov 24  }
  0x1c   : > { %223 = vst.msk [vmem:[#allocation2 + $0x48] sm:$0xff] %vm212_vm0, %v2743_v0  ;;  %v272_v6 = vld [vmem:[%s2896_s6 + $0x20] sm:$0xff]  ;;  %v273_v7 = vld [vmem:[%s2896_s6 + $0x28] sm:$0xff]  ;;  %v275_v9 = vld [vmem:[%s2896_s6 + $0x38] sm:$0xff] }
  0x1d   : > { %224 = vst.msk [vmem:[#allocation2 + $0x50] sm:$0xff] %vm212_vm0, %v2743_v0  ;;  %v276_v10 = vld [vmem:[%s2896_s6 + $0x40] sm:$0xff]  ;;  %v271_v11 = vld [vmem:[%s2896_s6 + $0x18] sm:$0xff]  ;;  %v278_v12 = vld [vmem:[%s2896_s6 + $0x50] sm:$0xff] }
  0x1e   : > { %v397_v1 = vld [vmem:[#allocation2 + $0x1] sm:$0xff]  ;;  %226 = vst.msk [vmem:[#allocation2 + $0x60] sm:$0xff] %vm212_vm0, %v2743_v0  ;;  %v279_v13 = vld [vmem:[%s2896_s6 + $0x58] sm:$0xff]  ;;  %v274_v14 = vld [vmem:[%s2896_s6 + $0x30] sm:$0xff] }
  0x1f   : > { %461 = vrot.lane.b32.xlu0 %v397_v1, %s2744_s27  ;;  %227 = vst.msk [vmem:[#allocation2 + $0x68] sm:$0xff] %vm212_vm0, %v2743_v0  ;;  %v281_v16 = vld [vmem:[%s2896_s6 + $0x68] sm:$0xff]  ;;  %v282_v18 = vld [vmem:[%s2896_s6 + $0x70] sm:$0xff]  ;;  %v284_v21 = vld [vmem:[%s2896_s6 + $0x80] sm:$0xff] }
  0x20   : > { %229 = vst.msk [vmem:[#allocation2 + $0x78] sm:$0xff] %vm212_vm0, %v2743_v0  ;;  %v277_v19 = vld [vmem:[%s2896_s6 + $0x48] sm:$0xff]  ;;  %v280_v23 = vld [vmem:[%s2896_s6 + $0x60] sm:$0xff]  ;;  %v287_v25 = vld [vmem:[%s2896_s6 + $0x98] sm:$0xff] }
  0x21   : > { %230 = vst.msk [vmem:[#allocation2 + $0x80] sm:$0xff] %vm212_vm0, %v2743_v0  ;;  %v285_v22 = vld [vmem:[%s2896_s6 + $0x88] sm:$0xff]  ;;  %v288_v27 = vld [vmem:[%s2896_s6 + $0xa0] sm:$0xff]  ;;  %v283_v29 = vld [vmem:[%s2896_s6 + $0x78] sm:$0xff] }
  0x22   : > { %232 = vst.msk [vmem:[#allocation2 + $0x90] sm:$0xff] %vm212_vm0, %v2743_v0  ;;  %v290_v30 = vld [vmem:[%s2896_s6 + $0xb0] sm:$0xff]  ;;  %v291_v33 = vld [vmem:[%s2896_s6 + $0xb8] sm:$0xff]  ;;  %v293_v36 = vld [vmem:[%s2896_s6 + $0xc8] sm:$0xff] }
  0x23   : > { %233 = vst.msk [vmem:[#allocation2 + $0x98] sm:$0xff] %vm212_vm0, %v2743_v0  ;;  %v286_v35 = vld [vmem:[%s2896_s6 + $0x90] sm:$0xff]  ;;  %v289_v41 = vld [vmem:[%s2896_s6 + $0xa8] sm:$0xff]  ;;  %v296_v42 = vld [vmem:[%s2896_s6 + $0xe0] sm:$0xff] }
  0x24   : > { %235 = vst.msk [vmem:[#allocation2 + $0xa8] sm:$0xff] %vm212_vm0, %v2743_v0  ;;  %v294_v39 = vld [vmem:[%s2896_s6 + $0xd0] sm:$0xff]  ;;  %v297_v45 = vld [vmem:[%s2896_s6 + $0xe8] sm:$0xff]  ;;  %v292_v47 = vld [vmem:[%s2896_s6 + $0xc0] sm:$0xff] }
  0x25   : > { %236 = vst.msk [vmem:[#allocation2 + $0xb0] sm:$0xff] %vm212_vm0, %v2743_v0  ;;  %v295_v51 = vld [vmem:[%s2896_s6 + $0xd8] sm:$0xff]  ;;  %v333_v63 = vld [vmem:[#allocation2] sm:$0xff] }
  0x26   : > { %238 = vst.msk [vmem:[#allocation2 + $0xc0] sm:$0xff] %vm212_vm0, %v2743_v0 }
  0x27   : > { %239 = vst.msk [vmem:[#allocation2 + $0xc8] sm:$0xff] %vm212_vm0, %v2743_v0 }
  0x28   : > { %241 = vst.msk [vmem:[#allocation2 + $0xd8] sm:$0xff] %vm212_vm0, %v2743_v0 }
  0x29   : > { %242 = vst.msk [vmem:[#allocation2 + $0xe0] sm:$0xff] %vm212_vm0, %v2743_v0 }
  0x2a   : > { %244 = vst.msk [vmem:[#allocation2 + $0xf0] sm:$0xff] %vm212_vm0, %v2743_v0 }
  0x2b   : > { %245 = vst.msk [vmem:[#allocation2 + $0xf8] sm:$0xff] %vm212_vm0, %v2743_v0 }
  0x2c   : > { %247 = vst.msk [vmem:[#allocation2 + $0x108] sm:$0xff] %vm212_vm0, %v2743_v0 }
  0x2d   : > { %248 = vst.msk [vmem:[#allocation2 + $0x110] sm:$0xff] %vm212_vm0, %v2743_v0 }
  0x2e   : > { %250 = vst.msk [vmem:[#allocation2 + $0x120] sm:$0xff] %vm212_vm0, %v2743_v0 }
  0x2f   : > { %251 = vst.msk [vmem:[#allocation2 + $0x128] sm:$0xff] %vm212_vm0, %v2743_v0 }
  0x30   : > { %253 = vst.msk [vmem:[#allocation2 + $0x138] sm:$0xff] %vm212_vm0, %v2743_v0 }
  0x31   : > { %254 = vst.msk [vmem:[#allocation2 + $0x140] sm:$0xff] %vm212_vm0, %v2743_v0 }
  0x32   : > { %256 = vst.msk [vmem:[#allocation2 + $0x150] sm:$0xff] %vm212_vm0, %v2743_v0 }
  0x33   : > { %257 = vst.msk [vmem:[#allocation2 + $0x158] sm:$0xff] %vm212_vm0, %v2743_v0 }
  0x34   : > { %259 = vst.msk [vmem:[#allocation2 + $0x168] sm:$0xff] %vm212_vm0, %v2743_v0 }
  0x35   : > { %260 = vst.msk [vmem:[#allocation2 + $0x170] sm:$0xff] %vm212_vm0, %v2743_v0 }
  0x36   : > { %262 = vst.msk [vmem:[#allocation2 + $0x180] sm:$0xff] %vm212_vm0, %v2743_v0 }
  0x37   : > { %263 = vst.msk [vmem:[#allocation2 + $0x188] sm:$0xff] %vm212_vm0, %v2743_v0 }
  0x38   : > { %265 = vst.msk [vmem:[#allocation2 + $0x198] sm:$0xff] %vm212_vm0, %v2743_v0 }
  0x39   : > { %266 = vst.msk [vmem:[#allocation2 + $0x1a0] sm:$0xff] %vm212_vm0, %v2743_v0 }
  0x3a   : > { %301 = vst.msk [vmem:[#allocation2 + $0x19] sm:$0xff] %vm212_vm0, %v268_v2 }
  0x3b   : > { %216 = vst.msk [vmem:[#allocation2 + $0x10] sm:$0x3] %vm215_vm1, %v2743_v0 }
  0x3c   : > { %219 = vst.msk [vmem:[#allocation2 + $0x28] sm:$0x3] %vm215_vm1, %v2743_v0 }
  0x3d   : > { %222 = vst.msk [vmem:[#allocation2 + $0x40] sm:$0x3] %vm215_vm1, %v2743_v0 }
  0x3e   : > { %225 = vst.msk [vmem:[#allocation2 + $0x58] sm:$0x3] %vm215_vm1, %v2743_v0 }
  0x3f   : > { %228 = vst.msk [vmem:[#allocation2 + $0x70] sm:$0x3] %vm215_vm1, %v2743_v0 }
  0x40   : > { %231 = vst.msk [vmem:[#allocation2 + $0x88] sm:$0x3] %vm215_vm1, %v2743_v0 }
  0x41   : > { %v2922_v3 = vld [vmem:[#allocation2 + $0x19] sm:$0xff]  ;;  %234 = vst.msk [vmem:[#allocation2 + $0xa0] sm:$0x3] %vm215_vm1, %v2743_v0 }
  0x42   : > { %465 = vrot.lane.b32.xlu1 %v2922_v3, %s2744_s27  ;;  %v398_v4 = vld [vmem:[#allocation2 + $0x9] sm:$0xff]  ;;  %237 = vst.msk [vmem:[#allocation2 + $0xb8] sm:$0x3] %vm215_vm1, %v2743_v0 }
  0x43   : > { %463 = vrot.lane.b32.xlu0 %v398_v4, %s2744_s27  ;;  %240 = vst.msk [vmem:[#allocation2 + $0xd0] sm:$0x3] %vm215_vm1, %v2743_v0  ;;  %v591_v1 = vld [vmem:[#allocation2 + $0xa] sm:$0xff]  ;;  %v3130_v4 = vld [vmem:[#allocation2 + $0x18] sm:$0xff] }
  0x44   : > { %243 = vst.msk [vmem:[#allocation2 + $0xe8] sm:$0x3] %vm215_vm1, %v2743_v0 }
  0x45   : > { %246 = vst.msk [vmem:[#allocation2 + $0x100] sm:$0x3] %vm215_vm1, %v2743_v0 }
  0x46   : > { %249 = vst.msk [vmem:[#allocation2 + $0x118] sm:$0x3] %vm215_vm1, %v2743_v0 }
  0x47   : > { %252 = vst.msk [vmem:[#allocation2 + $0x130] sm:$0x3] %vm215_vm1, %v2743_v0 }
  0x48   : > { %255 = vst.msk [vmem:[#allocation2 + $0x148] sm:$0x3] %vm215_vm1, %v2743_v0 }
  0x49   : > { %258 = vst.msk [vmem:[#allocation2 + $0x160] sm:$0x3] %vm215_vm1, %v2743_v0 }
  0x4a   : > { %261 = vst.msk [vmem:[#allocation2 + $0x178] sm:$0x3] %vm215_vm1, %v2743_v0 }
  0x4b   : > { %264 = vst.msk [vmem:[#allocation2 + $0x190] sm:$0x3] %vm215_vm1, %v2743_v0 }
  0x4c   : > { %267 = vst.msk [vmem:[#allocation2 + $0x1a8] sm:$0x3] %vm215_vm1, %v2743_v0 }
  0x4d   : > { %302 = vst.msk [vmem:[#allocation2 + $0x21] sm:$0xff] %vm212_vm0, %v269_v5 }
  0x4e   : > { %305 = vst.msk [vmem:[#allocation2 + $0x49] sm:$0xff] %vm212_vm0, %v272_v6  ;;  %v334_v6 = vld [vmem:[#allocation2 + $0x8] sm:$0xff] }
  0x4f   : > { %306 = vst.msk [vmem:[#allocation2 + $0x51] sm:$0xff] %vm212_vm0, %v273_v7 }
  0x50   : > { %303 = vst.msk [vmem:[#allocation2 + $0x31] sm:$0xff] %vm212_vm0, %v270_v8 }
  0x51   : > { %308 = vst.msk [vmem:[#allocation2 + $0x69] sm:$0xff] %vm212_vm0, %v275_v9  ;;  %v590_v9 = vld [vmem:[#allocation2 + $0x2] sm:$0xff] }
  0x52   : > { %309 = vst.msk [vmem:[#allocation2 + $0x79] sm:$0xff] %vm212_vm0, %v276_v10 }
  0x53   : > { %304 = vst.msk [vmem:[#allocation2 + $0x39] sm:$0xff] %vm212_vm0, %v271_v11 }
  0x54   : > { %v2968_v15 = vld [vmem:[#allocation2 + $0x21] sm:$0xff]  ;;  %311 = vst.msk [vmem:[#allocation2 + $0x91] sm:$0xff] %vm212_vm0, %v278_v12 }
  0x55   : > { %467 = vrot.lane.b32.xlu1 %v2968_v15, %s2744_s27  ;;  %v2974_v17 = vld [vmem:[#allocation2 + $0x49] sm:$0xff]  ;;  %312 = vst.msk [vmem:[#allocation2 + $0x99] sm:$0xff] %vm212_vm0, %v279_v13  ;;  %v3141_v7 = vld [vmem:[#allocation2 + $0x1a] sm:$0xff] }
  0x56   : > { %473 = vrot.lane.b32.xlu0 %v2974_v17, %s2744_s27  ;;  %307 = vst.msk [vmem:[#allocation2 + $0x61] sm:$0xff] %vm212_vm0, %v274_v14  ;;  %v2992_v24 = vld [vmem:[#allocation2 + $0x51] sm:$0xff]  ;;  %v3149_v10 = vld [vmem:[#allocation2 + $0x20] sm:$0xff]  ;;  %v3156_v12 = vld [vmem:[#allocation2 + $0x48] sm:$0xff] }
  0x57   : > { %v2982_v20 = vld [vmem:[#allocation2 + $0x31] sm:$0xff]  ;;  %314 = vst.msk [vmem:[#allocation2 + $0xb1] sm:$0xff] %vm212_vm0, %v281_v16  ;;  %v3168_v16 = vld [vmem:[#allocation2 + $0x22] sm:$0xff] }
  0x58   : > { %469 = vrot.lane.b32.xlu2 %v2982_v20, %s2744_s27  ;;  %315 = vst.msk [vmem:[#allocation2 + $0xc1] sm:$0xff] %vm212_vm0, %v282_v18  ;;  %v2996_v26 = vld [vmem:[#allocation2 + $0x69] sm:$0xff]  ;;  %v3164_v14 = vld [vmem:[#allocation2 + $0x52] sm:$0xff] }
  0x59   : > { %310 = vst.msk [vmem:[#allocation2 + $0x81] sm:$0xff] %vm212_vm0, %v277_v19  ;;  %v3015_v31 = vld [vmem:[#allocation2 + $0x79] sm:$0xff]  ;;  %v3115_v61 = vld [vmem:[#allocation2 + $0x30] sm:$0xff] }
  0x5a   : > { %317 = vst.msk [vmem:[#allocation2 + $0xd9] sm:$0xff] %vm212_vm0, %v284_v21  ;;  %v3003_v28 = vld [vmem:[#allocation2 + $0x39] sm:$0xff]  ;;  %v3172_v18 = vld [vmem:[#allocation2 + $0x50] sm:$0xff] }
  0x5b   : > { %318 = vst.msk [vmem:[#allocation2 + $0xe1] sm:$0xff] %vm212_vm0, %v285_v22  ;;  %v3017_v32 = vld [vmem:[#allocation2 + $0x91] sm:$0xff]  ;;  %v3160_v13 = vld [vmem:[#allocation2 + $0x3a] sm:$0xff] }
  0x5c   : > { %313 = vst.msk [vmem:[#allocation2 + $0xa9] sm:$0xff] %vm212_vm0, %v280_v23  ;;  %v3033_v37 = vld [vmem:[#allocation2 + $0x99] sm:$0xff] }
  0x5d   : > { %475 = vrot.lane.b32.xlu1 %v2992_v24, %s2744_s27  ;;  %320 = vst.msk [vmem:[#allocation2 + $0xf9] sm:$0xff] %vm212_vm0, %v287_v25  ;;  %v3022_v34 = vld [vmem:[#allocation2 + $0x61] sm:$0xff]  ;;  %v3132_v5 = vld [vmem:[#allocation2 + $0x38] sm:$0xff] }
  0x5e   : > { %479 = vrot.lane.b32.xlu0 %v2996_v26, %s2744_s27  ;;  %321 = vst.msk [vmem:[#allocation2 + $0x109] sm:$0xff] %vm212_vm0, %v288_v27  ;;  %v3035_v38 = vld [vmem:[#allocation2 + $0xb1] sm:$0xff]  ;;  %v3154_v11 = vld [vmem:[#allocation2 + $0x60] sm:$0xff]  ;;  %v3180_v21 = vld [vmem:[#allocation2 + $0x68] sm:$0xff] }
  0x5f   : > { %316 = vst.msk [vmem:[#allocation2 + $0xc9] sm:$0xff] %vm212_vm0, %v283_v29  ;;  %v3051_v43 = vld [vmem:[#allocation2 + $0xc1] sm:$0xff]  ;;  %v3143_v8 = vld [vmem:[#allocation2 + $0x32] sm:$0xff]  ;;  %v3193_v29 = vld [vmem:[#allocation2 + $0x4a] sm:$0xff] }
  0x60   : > { %471 = vrot.lane.b32.xlu2 %v3003_v28, %s2744_s27  ;;  %323 = vst.msk [vmem:[#allocation2 + $0x121] sm:$0xff] %vm212_vm0, %v290_v30  ;;  %v3040_v40 = vld [vmem:[#allocation2 + $0x81] sm:$0xff] }
  0x61   : > { %324 = vst.msk [vmem:[#allocation2 + $0x129] sm:$0xff] %vm212_vm0, %v291_v33  ;;  %v3053_v44 = vld [vmem:[#allocation2 + $0xd9] sm:$0xff]  ;;  %v3184_v22 = vld [vmem:[#allocation2 + $0x62] sm:$0xff] }
  0x62   : > { %319 = vst.msk [vmem:[#allocation2 + $0xf1] sm:$0xff] %vm212_vm0, %v286_v35  ;;  %v3067_v48 = vld [vmem:[#allocation2 + $0xe1] sm:$0xff]  ;;  %v3199_v33 = vld [vmem:[#allocation2 + $0x78] sm:$0xff] }
  0x63   : > { %326 = vst.msk [vmem:[#allocation2 + $0x141] sm:$0xff] %vm212_vm0, %v293_v36  ;;  %v3058_v46 = vld [vmem:[#allocation2 + $0xa9] sm:$0xff]  ;;  %v3178_v19 = vld [vmem:[#allocation2 + $0x80] sm:$0xff] }
  0x64   : > { %327 = vst.msk [vmem:[#allocation2 + $0x151] sm:$0xff] %vm212_vm0, %v294_v39  ;;  %v3069_v49 = vld [vmem:[#allocation2 + $0xf9] sm:$0xff]  ;;  %v3205_v35 = vld [vmem:[#allocation2 + $0xa8] sm:$0xff]  ;;  %v3207_v36 = vld [vmem:[#allocation2 + $0x90] sm:$0xff] }
  0x65   : > { %481 = vrot.lane.b32.xlu1 %v3015_v31, %s2744_s27  ;;  %322 = vst.msk [vmem:[#allocation2 + $0x111] sm:$0xff] %vm212_vm0, %v289_v41  ;;  %v3081_v52 = vld [vmem:[#allocation2 + $0x109] sm:$0xff]  ;;  %v3188_v25 = vld [vmem:[#allocation2 + $0x7a] sm:$0xff] }
  0x66   : > { %485 = vrot.lane.b32.xlu0 %v3017_v32, %s2744_s27  ;;  %329 = vst.msk [vmem:[#allocation2 + $0x169] sm:$0xff] %vm212_vm0, %v296_v42  ;;  %v3073_v50 = vld [vmem:[#allocation2 + $0xc9] sm:$0xff]  ;;  %v3215_v42 = vld [vmem:[#allocation2 + $0x9a] sm:$0xff] }
  0x67   : > { %330 = vst.msk [vmem:[#allocation2 + $0x171] sm:$0xff] %vm212_vm0, %v297_v45  ;;  %v3083_v53 = vld [vmem:[#allocation2 + $0x121] sm:$0xff]  ;;  %v3220_v45 = vld [vmem:[#allocation2 + $0x6a] sm:$0xff] }
  0x68   : > { %477 = vrot.lane.b32.xlu2 %v3022_v34, %s2744_s27  ;;  %325 = vst.msk [vmem:[#allocation2 + $0x139] sm:$0xff] %vm212_vm0, %v292_v47  ;;  %v3093_v55 = vld [vmem:[#allocation2 + $0x129] sm:$0xff]  ;;  %v3224_v47 = vld [vmem:[#allocation2 + $0x98] sm:$0xff] }
  0x69   : > { %328 = vst.msk [vmem:[#allocation2 + $0x159] sm:$0xff] %vm212_vm0, %v295_v51  ;;  %v3087_v54 = vld [vmem:[#allocation2 + $0xf1] sm:$0xff]  ;;  %v3211_v39 = vld [vmem:[#allocation2 + $0x82] sm:$0xff] }
  0x6a   : > { %v3095_v56 = vld [vmem:[#allocation2 + $0x141] sm:$0xff]  ;;  %369 = vst.msk [vmem:[#allocation3 + $0x20] sm:$0xff] %vm212_vm0, %v3115_v61 }
  0x6b   : > { %v3105_v58 = vld [vmem:[#allocation2 + $0x151] sm:$0xff]  ;;  %365 = vst.msk [vmem:[#allocation3] sm:$0xff] %vm212_vm0, %v333_v63  ;;  %v3230_v51 = vld [vmem:[#allocation2 + $0xc8] sm:$0xff] }
  0x6c   : > { %v3099_v57 = vld [vmem:[#allocation2 + $0x111] sm:$0xff]  ;;  %4177 = vst [vmem:[#allocation11_spill] sm:$0xff] %v3105_v58 }
  0x6d   : > { %487 = vrot.lane.b32.xlu1 %v3033_v37, %s2744_s27  ;;  %v3107_v59 = vld [vmem:[#allocation2 + $0x169] sm:$0xff]  ;;  %367 = vst.msk [vmem:[#allocation3 + $0x10] sm:$0xff] %vm212_vm0, %v3130_v4 }
  0x6e   : > { %491 = vrot.lane.b32.xlu0 %v3035_v38, %s2744_s27  ;;  %v3123_v0 = vld [vmem:[#allocation2 + $0x171] sm:$0xff]  ;;  %370 = vst.msk [vmem:[#allocation3 + $0x28] sm:$0xff] %vm212_vm0, %v3132_v5 }
  0x6f   : > { %v3111_v60 = vld [vmem:[#allocation2 + $0x139] sm:$0xff]  ;;  %4178 = vst [vmem:[#allocation12_spill] sm:$0xff] %v3123_v0  ;;  %v3236_v63 = vld [vmem:[#allocation2 + $0xaa] sm:$0xff] }
  0x70   : > { %483 = vrot.lane.b32.xlu2 %v3040_v40, %s2744_s27  ;;  %v3127_v2 = vld [vmem:[#allocation2 + $0x159] sm:$0xff]  ;;  %366 = vst.msk [vmem:[#allocation3 + $0x8] sm:$0xff] %vm212_vm0, %v334_v6  ;;  %v3240_v6 = vld [vmem:[#allocation2 + $0xc2] sm:$0xff] }
  0x71   : > { %4179 = vst [vmem:[#allocation13_spill] sm:$0xff] %v3141_v7 }
  0x72   : > { %4180 = vst [vmem:[#allocation14_spill] sm:$0xff] %v3143_v8 }
  0x73   : > { %368 = vst.msk [vmem:[#allocation3 + $0x18] sm:$0xff] %vm212_vm0, %v3149_v10 }
  0x74   : > { %373 = vst.msk [vmem:[#allocation3 + $0x40] sm:$0xff] %vm212_vm0, %v3154_v11 }
  0x75   : > { %493 = vrot.lane.b32.xlu1 %v3051_v43, %s2744_s27  ;;  %4181 = vst [vmem:[#allocation15_spill] sm:$0xff] %v3160_v13 }
  0x76   : > { %497 = vrot.lane.b32.xlu0 %v3053_v44, %s2744_s27  ;;  %371 = vst.msk [vmem:[#allocation3 + $0x30] sm:$0xff] %vm212_vm0, %v3156_v12 }
  0x77   : > { %4182 = vst [vmem:[#allocation16_spill] sm:$0xff] %v3164_v14 }
  0x78   : > { %489 = vrot.lane.b32.xlu2 %v3058_v46, %s2744_s27  ;;  %4183 = vst [vmem:[#allocation17_spill] sm:$0xff] %v3168_v16 }
  0x79   : > { %372 = vst.msk [vmem:[#allocation3 + $0x38] sm:$0xff] %vm212_vm0, %v3172_v18 }
  0x7a   : > { %376 = vst.msk [vmem:[#allocation3 + $0x58] sm:$0xff] %vm212_vm0, %v3178_v19 }
  0x7b   : > { %4184 = vst [vmem:[#allocation18_spill] sm:$0xff] %v3184_v22 }
  0x7c   : > { %374 = vst.msk [vmem:[#allocation3 + $0x48] sm:$0xff] %vm212_vm0, %v3180_v21 }
  0x7d   : > { %499 = vrot.lane.b32.xlu1 %v3067_v48, %s2744_s27  ;;  %4185 = vst [vmem:[#allocation19_spill] sm:$0xff] %v3188_v25 }
  0x7e   : > { %503 = vrot.lane.b32.xlu0 %v3069_v49, %s2744_s27  ;;  %4186 = vst [vmem:[#allocation20_spill] sm:$0xff] %v3193_v29 }
  0x7f   : > { %375 = vst.msk [vmem:[#allocation3 + $0x50] sm:$0xff] %vm212_vm0, %v3199_v33 }
  0x80   : > { %495 = vrot.lane.b32.xlu2 %v3073_v50, %s2744_s27  ;;  %379 = vst.msk [vmem:[#allocation3 + $0x70] sm:$0xff] %vm212_vm0, %v3205_v35 }
  0x81   : > { %4187 = vst [vmem:[#allocation21_spill] sm:$0xff] %v3211_v39 }
  0x82   : > { %377 = vst.msk [vmem:[#allocation3 + $0x60] sm:$0xff] %vm212_vm0, %v3207_v36 }
  0x83   : > { %4188 = vst [vmem:[#allocation22_spill] sm:$0xff] %v3215_v42 }
  0x84   : > { %4189 = vst [vmem:[#allocation23_spill] sm:$0xff] %v3220_v45 }
  0x85   : > { %505 = vrot.lane.b32.xlu1 %v3081_v52, %s2744_s27  ;;  %378 = vst.msk [vmem:[#allocation3 + $0x68] sm:$0xff] %vm212_vm0, %v3224_v47 }
  0x86   : > { %509 = vrot.lane.b32.xlu0 %v3083_v53, %s2744_s27  ;;  %382 = vst.msk [vmem:[#allocation3 + $0x88] sm:$0xff] %vm212_vm0, %v3230_v51 }
  0x87   : > { %4190 = vst [vmem:[#allocation24_spill] sm:$0xff] %v3236_v63 }
  0x88   : > { %501 = vrot.lane.b32.xlu2 %v3087_v54, %s2744_s27  ;;  %4191 = vst [vmem:[#allocation25_spill] sm:$0xff] %v3240_v6 }
  0x8d   : > { %511 = vrot.lane.b32.xlu1 %v3093_v55, %s2744_s27 }
  0x8e   : > { %515 = vrot.lane.b32.xlu0 %v3095_v56, %s2744_s27 }
  0x90   : > { %507 = vrot.lane.b32.xlu2 %v3099_v57, %s2744_s27 }
  0x91   : > { %v462_v62 = vpop.permute.xlu0 %461 }
  0x92   : > { %558 = vst.msk [vmem:[#allocation3] sm:$0xff] %vm557_vm2, %v462_v62  ;;  %v3232_v62 = vld [vmem:[#allocation2 + $0xb0] sm:$0xff] }
  0x93   : > { %380 = vst.msk [vmem:[#allocation3 + $0x78] sm:$0xff] %vm212_vm0, %v3232_v62 }
  0x95   : > { %517 = vrot.lane.b32.xlu1 %v3105_v58, %s2744_s27 }
  0x96   : > { %521 = vrot.lane.b32.xlu0 %v3107_v59, %s2744_s27 }
  0x98   : > { %513 = vrot.lane.b32.xlu2 %v3111_v60, %s2744_s27 }
  0x9d   : > { %523 = vrot.lane.b32.xlu1 %v3123_v0, %s2744_s27  ;;  %v3364_v0 = vld [vmem:[#allocation2 + $0x168] sm:$0xff] }
  0x9e   : > { %656 = vrot.lane.b32.xlu0 %v591_v1, %s2745_s7  ;;  %395 = vst.msk [vmem:[#allocation3 + $0xf0] sm:$0xff] %vm212_vm0, %v3364_v0 }
  0xa0   : > { %519 = vrot.lane.b32.xlu2 %v3127_v2, %s2744_s27 }
  0xa5   : > { %658 = vrot.lane.b32.xlu1 %v3141_v7, %s2745_s7  ;;  %v3337_v7 = vld [vmem:[#allocation2 + $0x158] sm:$0xff] }
  0xa6   : > { %662 = vrot.lane.b32.xlu0 %v3143_v8, %s2745_s7  ;;  %394 = vst.msk [vmem:[#allocation3 + $0xe8] sm:$0xff] %vm212_vm0, %v3337_v7  ;;  %v3346_v8 = vld [vmem:[#allocation2 + $0x152] sm:$0xff] }
  0xa7   : > { %4203 = vst [vmem:[#allocation37_spill] sm:$0xff] %v3346_v8 }
  0xa8   : > { %654 = vrot.lane.b32.xlu2 %v590_v9, %s2745_s7  ;;  %v3245_v9 = vld [vmem:[#allocation2 + $0x92] sm:$0xff] }
  0xa9   : > { %4192 = vst [vmem:[#allocation26_spill] sm:$0xff] %v3245_v9 }
  0xad   : > { %664 = vrot.lane.b32.xlu1 %v3160_v13, %s2745_s7  ;;  %v3310_v13 = vld [vmem:[#allocation2 + $0x138] sm:$0xff] }
  0xae   : > { %668 = vrot.lane.b32.xlu0 %v3164_v14, %s2745_s7  ;;  %391 = vst.msk [vmem:[#allocation3 + $0xd0] sm:$0xff] %vm212_vm0, %v3310_v13  ;;  %v3319_v14 = vld [vmem:[#allocation2 + $0x12a] sm:$0xff] }
  0xaf   : > { %4200 = vst [vmem:[#allocation34_spill] sm:$0xff] %v3319_v14 }
  0xb0   : > { %660 = vrot.lane.b32.xlu2 %v3168_v16, %s2745_s7 }
  0xb2   : > { %v470_v23 = vpop.permute.xlu2 %469 }
  0xb3   : > { %562 = vst.msk [vmem:[#allocation3 + $0x20] sm:$0xff] %vm557_vm2, %v470_v23  ;;  %v3249_v23 = vld [vmem:[#allocation2 + $0xc0] sm:$0xff] }
  0xb4   : > { %v466_v27 = vpop.permute.xlu1 %465  ;;  %381 = vst.msk [vmem:[#allocation3 + $0x80] sm:$0xff] %vm212_vm0, %v3249_v23 }
  0xb5   : > { %670 = vrot.lane.b32.xlu1 %v3184_v22, %s2745_s7  ;;  %560 = vst.msk [vmem:[#allocation3 + $0x10] sm:$0xff] %vm557_vm2, %v466_v27  ;;  %v464_v30 = vpop.permute.xlu0 %463  ;;  %v3283_v22 = vld [vmem:[#allocation2 + $0x110] sm:$0xff] }
  0xb6   : > { %674 = vrot.lane.b32.xlu0 %v3188_v25, %s2745_s7  ;;  %559 = vst.msk [vmem:[#allocation3 + $0x8] sm:$0xff] %vm557_vm2, %v464_v30  ;;  %v3292_v25 = vld [vmem:[#allocation2 + $0x10a] sm:$0xff] }
  0xb7   : > { %388 = vst.msk [vmem:[#allocation3 + $0xb8] sm:$0xff] %vm212_vm0, %v3283_v22 }
  0xb8   : > { %666 = vrot.lane.b32.xlu2 %v3193_v29, %s2745_s7  ;;  %4197 = vst [vmem:[#allocation31_spill] sm:$0xff] %v3292_v25  ;;  %v3342_v29 = vld [vmem:[#allocation2 + $0x13a] sm:$0xff] }
  0xb9   : > { %4202 = vst [vmem:[#allocation36_spill] sm:$0xff] %v3342_v29 }
  0xba   : > { %v472_v41 = vpop.permute.xlu2 %471 }
  0xbb   : > { %563 = vst.msk [vmem:[#allocation3 + $0x28] sm:$0xff] %vm557_vm2, %v472_v41  ;;  %v3256_v41 = vld [vmem:[#allocation2 + $0xf0] sm:$0xff] }
  0xbc   : > { %385 = vst.msk [vmem:[#allocation3 + $0xa0] sm:$0xff] %vm212_vm0, %v3256_v41 }
  0xbd   : > { %676 = vrot.lane.b32.xlu1 %v3211_v39, %s2745_s7  ;;  %v3265_v39 = vld [vmem:[#allocation2 + $0xe2] sm:$0xff] }
  0xbe   : > { %680 = vrot.lane.b32.xlu0 %v3215_v42, %s2745_s7  ;;  %4194 = vst [vmem:[#allocation28_spill] sm:$0xff] %v3265_v39 }
  0xc0   : > { %672 = vrot.lane.b32.xlu2 %v3220_v45, %s2745_s7  ;;  %v3315_v45 = vld [vmem:[#allocation2 + $0x112] sm:$0xff] }
  0xc1   : > { %4199 = vst [vmem:[#allocation33_spill] sm:$0xff] %v3315_v45 }
  0xc2   : > { %v478_v1 = vpop.permute.xlu2 %477 }
  0xc3   : > { %566 = vst.msk [vmem:[#allocation3 + $0x40] sm:$0xff] %vm557_vm2, %v478_v1  ;;  %v3259_v1 = vld [vmem:[#allocation2 + $0xd8] sm:$0xff] }
  0xc4   : > { %383 = vst.msk [vmem:[#allocation3 + $0x90] sm:$0xff] %vm212_vm0, %v3259_v1 }
  0xc5   : > { %682 = vrot.lane.b32.xlu1 %v3236_v63, %s2745_s7  ;;  %v3261_v63 = vld [vmem:[#allocation2 + $0xca] sm:$0xff] }
  0xc6   : > { %686 = vrot.lane.b32.xlu0 %v3240_v6, %s2745_s7  ;;  %4193 = vst [vmem:[#allocation27_spill] sm:$0xff] %v3261_v63 }
  0xc7   : > { %v468_v27 = vpop.permute.xlu1 %467 }
  0xc8   : > { %561 = vst.msk [vmem:[#allocation3 + $0x18] sm:$0xff] %vm557_vm2, %v468_v27  ;;  %v474_v30 = vpop.permute.xlu0 %473  ;;  %678 = vrot.lane.b32.xlu2 %v3245_v9, %s2745_s7  ;;  %v3272_v27 = vld [vmem:[#allocation2 + $0xb2] sm:$0xff] }
  0xc9   : > { %564 = vst.msk [vmem:[#allocation3 + $0x30] sm:$0xff] %vm557_vm2, %v474_v30  ;;  %v3276_v30 = vld [vmem:[#allocation2 + $0xe0] sm:$0xff]  ;;  %v3288_v9 = vld [vmem:[#allocation2 + $0xf2] sm:$0xff] }
  0xca   : > { %v484_v6 = vpop.permute.xlu2 %483  ;;  %4195 = vst [vmem:[#allocation29_spill] sm:$0xff] %v3272_v27 }
  0xcb   : > { %569 = vst.msk [vmem:[#allocation3 + $0x58] sm:$0xff] %vm557_vm2, %v484_v6 }
  0xcc   : > { %384 = vst.msk [vmem:[#allocation3 + $0x98] sm:$0xff] %vm212_vm0, %v3276_v30 }
  0xcd   : > { %688 = vrot.lane.b32.xlu1 %v3261_v63, %s2745_s7  ;;  %v3286_v63 = vld [vmem:[#allocation2 + $0xf8] sm:$0xff]  ;;  %4196 = vst [vmem:[#allocation30_spill] sm:$0xff] %v3288_v9 }
  0xce   : > { %692 = vrot.lane.b32.xlu0 %v3265_v39, %s2745_s7  ;;  %386 = vst.msk [vmem:[#allocation3 + $0xa8] sm:$0xff] %vm212_vm0, %v3286_v63 }
  0xcf   : > { %v476_v42 = vpop.permute.xlu1 %475 }
  0xd0   : > { %565 = vst.msk [vmem:[#allocation3 + $0x38] sm:$0xff] %vm557_vm2, %v476_v42  ;;  %v480_v6 = vpop.permute.xlu0 %479  ;;  %684 = vrot.lane.b32.xlu2 %v3272_v27, %s2745_s7  ;;  %v3299_v42 = vld [vmem:[#allocation2 + $0xda] sm:$0xff] }
  0xd1   : > { %567 = vst.msk [vmem:[#allocation3 + $0x48] sm:$0xff] %vm557_vm2, %v480_v6  ;;  %v3303_v6 = vld [vmem:[#allocation2 + $0x108] sm:$0xff] }
  0xd2   : > { %v490_v39 = vpop.permute.xlu2 %489  ;;  %4198 = vst [vmem:[#allocation32_spill] sm:$0xff] %v3299_v42 }
  0xd3   : > { %572 = vst.msk [vmem:[#allocation3 + $0x70] sm:$0xff] %vm557_vm2, %v490_v39 }
  0xd4   : > { %387 = vst.msk [vmem:[#allocation3 + $0xb0] sm:$0xff] %vm212_vm0, %v3303_v6 }
  0xd5   : > { %694 = vrot.lane.b32.xlu1 %v3288_v9, %s2745_s7  ;;  %v3313_v9 = vld [vmem:[#allocation2 + $0x120] sm:$0xff] }
  0xd6   : > { %698 = vrot.lane.b32.xlu0 %v3292_v25, %s2745_s7  ;;  %389 = vst.msk [vmem:[#allocation3 + $0xc0] sm:$0xff] %vm212_vm0, %v3313_v9 }
  0xd7   : > { %v482_v27 = vpop.permute.xlu1 %481 }
  0xd8   : > { %568 = vst.msk [vmem:[#allocation3 + $0x50] sm:$0xff] %vm557_vm2, %v482_v27  ;;  %v486_v39 = vpop.permute.xlu0 %485  ;;  %690 = vrot.lane.b32.xlu2 %v3299_v42, %s2745_s7  ;;  %v3326_v27 = vld [vmem:[#allocation2 + $0xfa] sm:$0xff] }
  0xd9   : > { %570 = vst.msk [vmem:[#allocation3 + $0x60] sm:$0xff] %vm557_vm2, %v486_v39  ;;  %v3330_v39 = vld [vmem:[#allocation2 + $0x128] sm:$0xff] }
  0xda   : > { %v496_v25 = vpop.permute.xlu2 %495  ;;  %4201 = vst [vmem:[#allocation35_spill] sm:$0xff] %v3326_v27 }
  0xdb   : > { %575 = vst.msk [vmem:[#allocation3 + $0x88] sm:$0xff] %vm557_vm2, %v496_v25 }
  0xdc   : > { %390 = vst.msk [vmem:[#allocation3 + $0xc8] sm:$0xff] %vm212_vm0, %v3330_v39 }
  0xdd   : > { %700 = vrot.lane.b32.xlu1 %v3315_v45, %s2745_s7  ;;  %v3340_v45 = vld [vmem:[#allocation2 + $0x140] sm:$0xff] }
  0xde   : > { %704 = vrot.lane.b32.xlu0 %v3319_v14, %s2745_s7  ;;  %392 = vst.msk [vmem:[#allocation3 + $0xd8] sm:$0xff] %vm212_vm0, %v3340_v45 }
  0xdf   : > { %v488_v42 = vpop.permute.xlu1 %487 }
  0xe0   : > { %571 = vst.msk [vmem:[#allocation3 + $0x68] sm:$0xff] %vm557_vm2, %v488_v42  ;;  %v492_v25 = vpop.permute.xlu0 %491  ;;  %696 = vrot.lane.b32.xlu2 %v3326_v27, %s2745_s7  ;;  %v3353_v42 = vld [vmem:[#allocation2 + $0x122] sm:$0xff] }
  0xe1   : > { %573 = vst.msk [vmem:[#allocation3 + $0x78] sm:$0xff] %vm557_vm2, %v492_v25  ;;  %v3357_v25 = vld [vmem:[#allocation2 + $0x150] sm:$0xff] }
  0xe2   : > { %v502_v14 = vpop.permute.xlu2 %501  ;;  %4204 = vst [vmem:[#allocation38_spill] sm:$0xff] %v3353_v42 }
  0xe3   : > { %578 = vst.msk [vmem:[#allocation3 + $0xa0] sm:$0xff] %vm557_vm2, %v502_v14 }
  0xe4   : > { %393 = vst.msk [vmem:[#allocation3 + $0xe0] sm:$0xff] %vm212_vm0, %v3357_v25 }
  0xe5   : > { %706 = vrot.lane.b32.xlu1 %v3342_v29, %s2745_s7  ;;  %v3367_v29 = vld [vmem:[#allocation2 + $0x15a] sm:$0xff] }
  0xe6   : > { %710 = vrot.lane.b32.xlu0 %v3346_v8, %s2745_s7  ;;  %4205 = vst [vmem:[#allocation39_spill] sm:$0xff] %v3367_v29  ;;  %v3371_v8 = vld [vmem:[#allocation2 + $0x172] sm:$0xff] }
  0xe7   : > { %v494_v27 = vpop.permute.xlu1 %493  ;;  %4206 = vst [vmem:[#allocation40_spill] sm:$0xff] %v3371_v8 }
  0xe8   : > { %574 = vst.msk [vmem:[#allocation3 + $0x80] sm:$0xff] %vm557_vm2, %v494_v27  ;;  %v498_v14 = vpop.permute.xlu0 %497  ;;  %702 = vrot.lane.b32.xlu2 %v3353_v42, %s2745_s7  ;;  %v3376_v27 = vld [vmem:[#allocation2 + $0x142] sm:$0xff]  ;;  %v3380_v42 = vld [vmem:[#allocation2 + $0x170] sm:$0xff] }
  0xe9   : > { %576 = vst.msk [vmem:[#allocation3 + $0x90] sm:$0xff] %vm557_vm2, %v498_v14 }
  0xea   : > { %v508_v16 = vpop.permute.xlu2 %507  ;;  %396 = vst.msk [vmem:[#allocation3 + $0xf8] sm:$0xff] %vm212_vm0, %v3380_v42 }
  0xeb   : > { %581 = vst.msk [vmem:[#allocation3 + $0xb8] sm:$0xff] %vm557_vm2, %v508_v16 }
  0xed   : > { %712 = vrot.lane.b32.xlu1 %v3367_v29, %s2745_s7  ;;  %v3391_v29 = vld [vmem:[#allocation2 + $0x16a] sm:$0xff] }
  0xee   : > { %716 = vrot.lane.b32.xlu0 %v3371_v8, %s2745_s7 }
  0xef   : > { %v500_v14 = vpop.permute.xlu1 %499 }
  0xf0   : > { %577 = vst.msk [vmem:[#allocation3 + $0x98] sm:$0xff] %vm557_vm2, %v500_v14  ;;  %v504_v58 = vpop.permute.xlu0 %503  ;;  %708 = vrot.lane.b32.xlu2 %v3376_v27, %s2745_s7 }
  0xf1   : > { %579 = vst.msk [vmem:[#allocation3 + $0xa8] sm:$0xff] %vm557_vm2, %v504_v58 }
  0xf2   : > { %v514_v16 = vpop.permute.xlu2 %513 }
  0xf3   : > { %584 = vst.msk [vmem:[#allocation3 + $0xd0] sm:$0xff] %vm557_vm2, %v514_v16 }
  0xf5   : > { %847 = vrot.lane.b32.xlu1 %v3130_v4, %s2746_s8 }
  0xf6   : > { %851 = vrot.lane.b32.xlu0 %v3115_v61, %s2746_s8 }
  0xf7   : > { %v506_v8 = vpop.permute.xlu1 %505 }
  0xf8   : > { %580 = vst.msk [vmem:[#allocation3 + $0xb0] sm:$0xff] %vm557_vm2, %v506_v8  ;;  %v510_v14 = vpop.permute.xlu0 %509  ;;  %714 = vrot.lane.b32.xlu2 %v3391_v29, %s2745_s7 }
  0xf9   : > { %582 = vst.msk [vmem:[#allocation3 + $0xc0] sm:$0xff] %vm557_vm2, %v510_v14  ;;  %v298_v14 = vld [vmem:[%s2896_s6 + $0xf0] sm:$0xff] }
  0xfa   : > { %v520_v58 = vpop.permute.xlu2 %519  ;;  %331 = vst.msk [vmem:[#allocation2 + $0x181] sm:$0xff] %vm212_vm0, %v298_v14 }
  0xfb   : > { %587 = vst.msk [vmem:[#allocation3 + $0xe8] sm:$0xff] %vm557_vm2, %v520_v58 }
  0xfd   : > { %853 = vrot.lane.b32.xlu1 %v3132_v5, %s2746_s8 }
  0xfe   : > { %857 = vrot.lane.b32.xlu0 %v3172_v18, %s2746_s8 }
  0xff   : > { %v512_v4 = vpop.permute.xlu1 %511 }
 0x100   : > { %583 = vst.msk [vmem:[#allocation3 + $0xc8] sm:$0xff] %vm557_vm2, %v512_v4  ;;  %v516_v61 = vpop.permute.xlu0 %515  ;;  %849 = vrot.lane.b32.xlu2 %v3149_v10, %s2746_s8  ;;  %v299_v4 = vld [vmem:[%s2896_s6 + $0xf8] sm:$0xff] }
 0x101   : > { %585 = vst.msk [vmem:[#allocation3 + $0xd8] sm:$0xff] %vm557_vm2, %v516_v61 }
 0x102   : > { %v655_v8 = vpop.permute.xlu2 %654  ;;  %332 = vst.msk [vmem:[#allocation2 + $0x189] sm:$0xff] %vm212_vm0, %v299_v4  ;;  %v4212_v4 = vld [vmem:[#allocation13_spill] sm:$0xff] }
 0x103   : > { %751 = vst.msk [vmem:[#allocation3] sm:$0xff] %vm750_vm3, %v655_v8 }
 0x105   : > { %859 = vrot.lane.b32.xlu1 %v3154_v11, %s2746_s8 }
 0x106   : > { %863 = vrot.lane.b32.xlu0 %v3199_v33, %s2746_s8 }
 0x107   : > { %v518_v5 = vpop.permute.xlu1 %517 }
 0x108   : > { %586 = vst.msk [vmem:[#allocation3 + $0xe0] sm:$0xff] %vm557_vm2, %v518_v5  ;;  %v522_v18 = vpop.permute.xlu0 %521  ;;  %855 = vrot.lane.b32.xlu2 %v3156_v12, %s2746_s8 }
 0x109   : > { %588 = vst.msk [vmem:[#allocation3 + $0xf0] sm:$0xff] %vm557_vm2, %v522_v18 }
 0x10a   : > { %v661_v10 = vpop.permute.xlu2 %660 }
 0x10b   : > { %754 = vst.msk [vmem:[#allocation3 + $0x18] sm:$0xff] %vm750_vm3, %v661_v10  ;;  %v814_v10 = vld [vmem:[#allocation2 + $0x188] sm:$0xff] }
 0x10d   : > { %865 = vrot.lane.b32.xlu1 %v3178_v19, %s2746_s8 }
 0x10e   : > { %869 = vrot.lane.b32.xlu0 %v3224_v47, %s2746_s8 }
 0x10f   : > { %v524_v11 = vpop.permute.xlu1 %523 }
 0x110   : > { %589 = vst.msk [vmem:[#allocation3 + $0xf8] sm:$0xff] %vm557_vm2, %v524_v11  ;;  %v657_v33 = vpop.permute.xlu0 %656  ;;  %861 = vrot.lane.b32.xlu2 %v3180_v21, %s2746_s8 }
 0x111   : > { %752 = vst.msk [vmem:[#allocation3 + $0x8] sm:$0xff] %vm750_vm3, %v657_v33 }
 0x112   : > { %v667_v12 = vpop.permute.xlu2 %666 }
 0x113   : > { %757 = vst.msk [vmem:[#allocation3 + $0x30] sm:$0xff] %vm750_vm3, %v667_v12  ;;  %v1006_v12 = vld [vmem:[#allocation2 + $0x181] sm:$0xff] }
 0x115   : > { %871 = vrot.lane.b32.xlu1 %v3205_v35, %s2746_s8 }
 0x116   : > { %875 = vrot.lane.b32.xlu0 %v3249_v23, %s2746_s8 }
 0x117   : > { %v659_v19 = vpop.permute.xlu1 %658 }
 0x118   : > { %753 = vst.msk [vmem:[#allocation3 + $0x10] sm:$0xff] %vm750_vm3, %v659_v19  ;;  %v663_v16 = vpop.permute.xlu0 %662  ;;  %867 = vrot.lane.b32.xlu2 %v3207_v36, %s2746_s8  ;;  %v4207_v19 = vld [vmem:[#allocation11_spill] sm:$0xff] }
 0x119   : > { %755 = vst.msk [vmem:[#allocation3 + $0x20] sm:$0xff] %vm750_vm3, %v663_v16 }
 0x11a   : > { %v673_v21 = vpop.permute.xlu2 %672 }
 0x11b   : > { %760 = vst.msk [vmem:[#allocation3 + $0x48] sm:$0xff] %vm750_vm3, %v673_v21 }
 0x11d   : > { %877 = vrot.lane.b32.xlu1 %v3230_v51, %s2746_s8 }
 0x11e   : > { %881 = vrot.lane.b32.xlu0 %v3276_v30, %s2746_s8 }
 0x11f   : > { %v665_v35 = vpop.permute.xlu1 %664 }
 0x120   : > { %756 = vst.msk [vmem:[#allocation3 + $0x28] sm:$0xff] %vm750_vm3, %v665_v35  ;;  %v669_v23 = vpop.permute.xlu0 %668  ;;  %873 = vrot.lane.b32.xlu2 %v3232_v62, %s2746_s8  ;;  %v4209_v35 = vld [vmem:[#allocation12_spill] sm:$0xff] }
 0x121   : > { %758 = vst.msk [vmem:[#allocation3 + $0x38] sm:$0xff] %vm750_vm3, %v669_v23 }
 0x122   : > { %v679_v58 = vpop.permute.xlu2 %678 }
 0x123   : > { %763 = vst.msk [vmem:[#allocation3 + $0x60] sm:$0xff] %vm750_vm3, %v679_v58  ;;  %v4210_v58 = vld [vmem:[#allocation14_spill] sm:$0xff] }
 0x125   : > { %883 = vrot.lane.b32.xlu1 %v3256_v41, %s2746_s8 }
 0x126   : > { %887 = vrot.lane.b32.xlu0 %v3303_v6, %s2746_s8 }
 0x127   : > { %v671_v51 = vpop.permute.xlu1 %670 }
 0x128   : > { %759 = vst.msk [vmem:[#allocation3 + $0x40] sm:$0xff] %vm750_vm3, %v671_v51  ;;  %v675_v30 = vpop.permute.xlu0 %674  ;;  %879 = vrot.lane.b32.xlu2 %v3259_v1, %s2746_s8  ;;  %v4211_v51 = vld [vmem:[#allocation20_spill] sm:$0xff] }
 0x129   : > { %761 = vst.msk [vmem:[#allocation3 + $0x50] sm:$0xff] %vm750_vm3, %v675_v30 }
 0x12a   : > { %v685_v62 = vpop.permute.xlu2 %684 }
 0x12b   : > { %766 = vst.msk [vmem:[#allocation3 + $0x78] sm:$0xff] %vm750_vm3, %v685_v62 }
 0x12d   : > { %889 = vrot.lane.b32.xlu1 %v3283_v22, %s2746_s8 }
 0x12e   : > { %893 = vrot.lane.b32.xlu0 %v3330_v39, %s2746_s8 }
 0x12f   : > { %v677_v6 = vpop.permute.xlu1 %676 }
 0x130   : > { %762 = vst.msk [vmem:[#allocation3 + $0x58] sm:$0xff] %vm750_vm3, %v677_v6  ;;  %v681_v61 = vpop.permute.xlu0 %680  ;;  %885 = vrot.lane.b32.xlu2 %v3286_v63, %s2746_s8 }
 0x131   : > { %764 = vst.msk [vmem:[#allocation3 + $0x68] sm:$0xff] %vm750_vm3, %v681_v61  ;;  %v4213_v61 = vld [vmem:[#allocation16_spill] sm:$0xff] }
 0x132   : > { %v691_v1 = vpop.permute.xlu2 %690 }
 0x133   : > { %769 = vst.msk [vmem:[#allocation3 + $0x90] sm:$0xff] %vm750_vm3, %v691_v1  ;;  %v4214_v1 = vld [vmem:[#allocation23_spill] sm:$0xff] }
 0x135   : > { %895 = vrot.lane.b32.xlu1 %v3310_v13, %s2746_s8 }
 0x136   : > { %899 = vrot.lane.b32.xlu0 %v3357_v25, %s2746_s8 }
 0x137   : > { %v683_v22 = vpop.permute.xlu1 %682 }
 0x138   : > { %765 = vst.msk [vmem:[#allocation3 + $0x70] sm:$0xff] %vm750_vm3, %v683_v22  ;;  %v687_v39 = vpop.permute.xlu0 %686  ;;  %891 = vrot.lane.b32.xlu2 %v3313_v9, %s2746_s8  ;;  %v813_v9 = vld [vmem:[#allocation2 + $0x180] sm:$0xff] }
 0x139   : > { %767 = vst.msk [vmem:[#allocation3 + $0x80] sm:$0xff] %vm750_vm3, %v687_v39 }
 0x13a   : > { %v697_v8 = vpop.permute.xlu2 %696 }
 0x13b   : > { %772 = vst.msk [vmem:[#allocation3 + $0xa8] sm:$0xff] %vm750_vm3, %v697_v8  ;;  %v4215_v8 = vld [vmem:[#allocation15_spill] sm:$0xff] }
 0x13d   : > { %901 = vrot.lane.b32.xlu1 %v3337_v7, %s2746_s8 }
 0x13e   : > { %905 = vrot.lane.b32.xlu0 %v3380_v42, %s2746_s8 }
 0x13f   : > { %v689_v13 = vpop.permute.xlu1 %688 }
 0x140   : > { %768 = vst.msk [vmem:[#allocation3 + $0x88] sm:$0xff] %vm750_vm3, %v689_v13  ;;  %v693_v5 = vpop.permute.xlu0 %692  ;;  %897 = vrot.lane.b32.xlu2 %v3340_v45, %s2746_s8 }
 0x141   : > { %770 = vst.msk [vmem:[#allocation3 + $0x98] sm:$0xff] %vm750_vm3, %v693_v5  ;;  %v4216_v5 = vld [vmem:[#allocation19_spill] sm:$0xff] }
 0x142   : > { %v703_v18 = vpop.permute.xlu2 %702 }
 0x143   : > { %775 = vst.msk [vmem:[#allocation3 + $0xc0] sm:$0xff] %vm750_vm3, %v703_v18 }
 0x145   : > { %907 = vrot.lane.b32.xlu1 %v813_v9, %s2746_s8  ;;  %v4217_v9 = vld [vmem:[#allocation26_spill] sm:$0xff] }
 0x146   : > { %1040 = vrot.lane.b32.xlu0 %v2922_v3, %s2747_s9 }
 0x147   : > { %v695_v7 = vpop.permute.xlu1 %694 }
 0x148   : > { %771 = vst.msk [vmem:[#allocation3 + $0xa0] sm:$0xff] %vm750_vm3, %v695_v7  ;;  %v699_v42 = vpop.permute.xlu0 %698  ;;  %903 = vrot.lane.b32.xlu2 %v3364_v0, %s2746_s8 }
 0x149   : > { %773 = vst.msk [vmem:[#allocation3 + $0xb0] sm:$0xff] %vm750_vm3, %v699_v42  ;;  %v4218_v42 = vld [vmem:[#allocation18_spill] sm:$0xff] }
 0x14a   : > { %v709_v45 = vpop.permute.xlu2 %708 }
 0x14b   : > { %778 = vst.msk [vmem:[#allocation3 + $0xd8] sm:$0xff] %vm750_vm3, %v709_v45 }
 0x14d   : > { %1042 = vrot.lane.b32.xlu1 %v2968_v15, %s2747_s9 }
 0x14e   : > { %1046 = vrot.lane.b32.xlu0 %v3003_v28, %s2747_s9 }
 0x14f   : > { %v701_v3 = vpop.permute.xlu1 %700 }
 0x150   : > { %774 = vst.msk [vmem:[#allocation3 + $0xb8] sm:$0xff] %vm750_vm3, %v701_v3  ;;  %v705_v11 = vpop.permute.xlu0 %704  ;;  %909 = vrot.lane.b32.xlu2 %v814_v10, %s2746_s8  ;;  %v4219_v10 = vld [vmem:[#allocation22_spill] sm:$0xff]  ;;  %v4220_v3 = vld [vmem:[#allocation29_spill] sm:$0xff]  ;;  %s2639_s8 = scalar_lea.hbm %s4142_s2, 512 }
 0x151   : > { %776 = vst.msk [vmem:[#allocation3 + $0xc8] sm:$0xff] %vm750_vm3, %v705_v11 }
 0x152   : > { %v715_v0 = vpop.permute.xlu2 %714 }
 0x153   : > { %781 = vst.msk [vmem:[#allocation3 + $0xf0] sm:$0xff] %vm750_vm3, %v715_v0 }
 0x155   : > { %1048 = vrot.lane.b32.xlu1 %v2974_v17, %s2747_s9 }
 0x156   : > { %1052 = vrot.lane.b32.xlu0 %v3022_v34, %s2747_s9 }
 0x157   : > { %v707_v15 = vpop.permute.xlu1 %706 }
 0x158   : > { %777 = vst.msk [vmem:[#allocation3 + $0xd0] sm:$0xff] %vm750_vm3, %v707_v15  ;;  %v711_v28 = vpop.permute.xlu0 %710  ;;  %1044 = vrot.lane.b32.xlu2 %v2982_v20, %s2747_s9  ;;  %v4221_v15 = vld [vmem:[#allocation21_spill] sm:$0xff] }
 0x159   : > { %779 = vst.msk [vmem:[#allocation3 + $0xe0] sm:$0xff] %vm750_vm3, %v711_v28 }
 0x15a   : > { %v850_v33 = vpop.permute.xlu2 %849 }
 0x15b   : > { %945 = vst.msk [vmem:[#allocation3 + $0x8] sm:$0xff] %vm943_vm4, %v850_v33  ;;  %v4222_v33 = vld [vmem:[#allocation25_spill] sm:$0xff] }
 0x15d   : > { %1054 = vrot.lane.b32.xlu1 %v2996_v26, %s2747_s9 }
 0x15e   : > { %1058 = vrot.lane.b32.xlu0 %v3040_v40, %s2747_s9 }
 0x15f   : > { %v713_v17 = vpop.permute.xlu1 %712 }
 0x160   : > { %780 = vst.msk [vmem:[#allocation3 + $0xe8] sm:$0xff] %vm750_vm3, %v713_v17  ;;  %v717_v34 = vpop.permute.xlu0 %716  ;;  %1050 = vrot.lane.b32.xlu2 %v2992_v24, %s2747_s9  ;;  %v4223_v17 = vld [vmem:[#allocation32_spill] sm:$0xff] }
 0x161   : > { %782 = vst.msk [vmem:[#allocation3 + $0xf8] sm:$0xff] %vm750_vm3, %v717_v34 }
 0x162   : > { %v856_v20 = vpop.permute.xlu2 %855 }
 0x163   : > { %948 = vst.msk [vmem:[#allocation3 + $0x20] sm:$0xff] %vm943_vm4, %v856_v20 }
 0x165   : > { %1060 = vrot.lane.b32.xlu1 %v3017_v32, %s2747_s9 }
 0x166   : > { %1064 = vrot.lane.b32.xlu0 %v3058_v46, %s2747_s9 }
 0x167   : > { %v848_v26 = vpop.permute.xlu1 %847 }
 0x168   : > { %944 = vst.msk [vmem:[#allocation3] sm:$0xff] %vm943_vm4, %v848_v26  ;;  %v852_v40 = vpop.permute.xlu0 %851  ;;  %1056 = vrot.lane.b32.xlu2 %v3015_v31, %s2747_s9  ;;  %v4224_v26 = vld [vmem:[#allocation24_spill] sm:$0xff] }
 0x169   : > { %946 = vst.msk [vmem:[#allocation3 + $0x10] sm:$0xff] %vm943_vm4, %v852_v40 }
 0x16a   : > { %v862_v24 = vpop.permute.xlu2 %861 }
 0x16b   : > { %951 = vst.msk [vmem:[#allocation3 + $0x38] sm:$0xff] %vm943_vm4, %v862_v24  ;;  %v4225_v24 = vld [vmem:[#allocation28_spill] sm:$0xff] }
 0x16d   : > { %1066 = vrot.lane.b32.xlu1 %v3035_v38, %s2747_s9 }
 0x16e   : > { %1070 = vrot.lane.b32.xlu0 %v3073_v50, %s2747_s9 }
 0x16f   : > { %v854_v32 = vpop.permute.xlu1 %853 }
 0x170   : > { %947 = vst.msk [vmem:[#allocation3 + $0x18] sm:$0xff] %vm943_vm4, %v854_v32  ;;  %v858_v46 = vpop.permute.xlu0 %857  ;;  %1062 = vrot.lane.b32.xlu2 %v3033_v37, %s2747_s9  ;;  %v4226_v32 = vld [vmem:[#allocation35_spill] sm:$0xff] }
 0x171   : > { %949 = vst.msk [vmem:[#allocation3 + $0x28] sm:$0xff] %vm943_vm4, %v858_v46 }
 0x172   : > { %v868_v31 = vpop.permute.xlu2 %867 }
 0x173   : > { %954 = vst.msk [vmem:[#allocation3 + $0x50] sm:$0xff] %vm943_vm4, %v868_v31 }
 0x175   : > { %1072 = vrot.lane.b32.xlu1 %v3053_v44, %s2747_s9 }
 0x176   : > { %1076 = vrot.lane.b32.xlu0 %v3087_v54, %s2747_s9 }
 0x177   : > { %v860_v38 = vpop.permute.xlu1 %859 }
 0x178   : > { %950 = vst.msk [vmem:[#allocation3 + $0x30] sm:$0xff] %vm943_vm4, %v860_v38  ;;  %v864_v50 = vpop.permute.xlu0 %863  ;;  %1068 = vrot.lane.b32.xlu2 %v3051_v43, %s2747_s9  ;;  %v4227_v38 = vld [vmem:[#allocation27_spill] sm:$0xff] }
 0x179   : > { %952 = vst.msk [vmem:[#allocation3 + $0x40] sm:$0xff] %vm943_vm4, %v864_v50 }
 0x17a   : > { %v874_v37 = vpop.permute.xlu2 %873 }
 0x17b   : > { %957 = vst.msk [vmem:[#allocation3 + $0x68] sm:$0xff] %vm943_vm4, %v874_v37  ;;  %v4228_v37 = vld [vmem:[#allocation31_spill] sm:$0xff] }
 0x17d   : > { %1078 = vrot.lane.b32.xlu1 %v3069_v49, %s2747_s9 }
 0x17e   : > { %1082 = vrot.lane.b32.xlu0 %v3099_v57, %s2747_s9 }
 0x17f   : > { %v866_v44 = vpop.permute.xlu1 %865 }
 0x180   : > { %953 = vst.msk [vmem:[#allocation3 + $0x48] sm:$0xff] %vm943_vm4, %v866_v44  ;;  %v870_v54 = vpop.permute.xlu0 %869  ;;  %1074 = vrot.lane.b32.xlu2 %v3067_v48, %s2747_s9  ;;  %v4229_v44 = vld [vmem:[#allocation38_spill] sm:$0xff] }
 0x181   : > { %955 = vst.msk [vmem:[#allocation3 + $0x58] sm:$0xff] %vm943_vm4, %v870_v54 }
 0x182   : > { %v880_v43 = vpop.permute.xlu2 %879 }
 0x183   : > { %960 = vst.msk [vmem:[#allocation3 + $0x80] sm:$0xff] %vm943_vm4, %v880_v43 }
 0x185   : > { %1084 = vrot.lane.b32.xlu1 %v3083_v53, %s2747_s9 }
 0x186   : > { %1088 = vrot.lane.b32.xlu0 %v3111_v60, %s2747_s9 }
 0x187   : > { %v872_v49 = vpop.permute.xlu1 %871 }
 0x188   : > { %956 = vst.msk [vmem:[#allocation3 + $0x60] sm:$0xff] %vm943_vm4, %v872_v49  ;;  %v876_v57 = vpop.permute.xlu0 %875  ;;  %1080 = vrot.lane.b32.xlu2 %v3081_v52, %s2747_s9  ;;  %v4230_v49 = vld [vmem:[#allocation30_spill] sm:$0xff] }
 0x189   : > { %958 = vst.msk [vmem:[#allocation3 + $0x70] sm:$0xff] %vm943_vm4, %v876_v57 }
 0x18a   : > { %v886_v48 = vpop.permute.xlu2 %885 }
 0x18b   : > { %963 = vst.msk [vmem:[#allocation3 + $0x98] sm:$0xff] %vm943_vm4, %v886_v48  ;;  %v4231_v48 = vld [vmem:[#allocation34_spill] sm:$0xff] }
 0x18d   : > { %1090 = vrot.lane.b32.xlu1 %v3095_v56, %s2747_s9 }
 0x18e   : > { %1094 = vrot.lane.b32.xlu0 %v3127_v2, %s2747_s9 }
 0x18f   : > { %v878_v53 = vpop.permute.xlu1 %877 }
 0x190   : > { %959 = vst.msk [vmem:[#allocation3 + $0x78] sm:$0xff] %vm943_vm4, %v878_v53  ;;  %v882_v60 = vpop.permute.xlu0 %881  ;;  %1086 = vrot.lane.b32.xlu2 %v3093_v55, %s2747_s9  ;;  %v1007_v55 = vld [vmem:[#allocation2 + $0x189] sm:$0xff] }
 0x191   : > { %961 = vst.msk [vmem:[#allocation3 + $0x88] sm:$0xff] %vm943_vm4, %v882_v60 }
 0x192   : > { %v892_v52 = vpop.permute.xlu2 %891 }
 0x193   : > { %966 = vst.msk [vmem:[#allocation3 + $0xb0] sm:$0xff] %vm943_vm4, %v892_v52  ;;  %v4232_v52 = vld [vmem:[#allocation33_spill] sm:$0xff] }
 0x195   : > { %1096 = vrot.lane.b32.xlu1 %v3107_v59, %s2747_s9  ;;  %v4208_v59 = vld [vmem:[#allocation17_spill] sm:$0xff] }
 0x196   : > { %1100 = vrot.lane.b32.xlu0 %v1006_v12, %s2747_s9 }
 0x197   : > { %v884_v56 = vpop.permute.xlu1 %883 }
 0x198   : > { %962 = vst.msk [vmem:[#allocation3 + $0x90] sm:$0xff] %vm943_vm4, %v884_v56  ;;  %v888_v2 = vpop.permute.xlu0 %887  ;;  %1092 = vrot.lane.b32.xlu2 %v4207_v19, %s2747_s9  ;;  %v4233_v56 = vld [vmem:[#allocation37_spill] sm:$0xff]  ;;  %v4234_v19 = vld [vmem:[#allocation36_spill] sm:$0xff] }
 0x199   : > { %964 = vst.msk [vmem:[#allocation3 + $0xa0] sm:$0xff] %vm943_vm4, %v888_v2 }
 0x19a   : > { %v898_v16 = vpop.permute.xlu2 %897 }
 0x19b   : > { %969 = vst.msk [vmem:[#allocation3 + $0xc8] sm:$0xff] %vm943_vm4, %v898_v16  ;;  %v1556_v16 = vld [vmem:[#allocation2 + $0x31] sm:$0xff] }
 0x19d   : > { %1102 = vrot.lane.b32.xlu1 %v1007_v55, %s2747_s9 }
 0x19e   : > { %1235 = vrot.lane.b32.xlu0 %v4208_v59, %s2748_s10  ;;  %v4235_v59 = vld [vmem:[#allocation40_spill] sm:$0xff] }
 0x19f   : > { %v890_v21 = vpop.permute.xlu1 %889 }
 0x1a0   : > { %965 = vst.msk [vmem:[#allocation3 + $0xa8] sm:$0xff] %vm943_vm4, %v890_v21  ;;  %v894_v14 = vpop.permute.xlu0 %893  ;;  %1098 = vrot.lane.b32.xlu2 %v4209_v35, %s2747_s9  ;;  %v1749_v35 = vld [vmem:[#allocation2 + $0x32] sm:$0xff]  ;;  %s3895_s9 = sand.u32 1, %s2733_s16  }
 0x1a1   : > { %967 = vst.msk [vmem:[#allocation3 + $0xb8] sm:$0xff] %vm943_vm4, %v894_v14  ;;  %v4236_v14 = vld [vmem:[#allocation39_spill] sm:$0xff]  ;;  %s2502_s14 = sshll.u32 %s3895_s9, 8  ;;  %s2334_s28 = scalar_lea.sflag [#allocation5], %s3895_s9 }
 0x1a2   : > { %v904_v23 = vpop.permute.xlu2 %903  ;;  %s3904_s22 = scalar_lea.vmem [#allocation4], %s2502_s14 }
 0x1a3   : > { %972 = vst.msk [vmem:[#allocation3 + $0xe0] sm:$0xff] %vm943_vm4, %v904_v23  ;;  %s2354_s23 = sshll.u32 %s3904_s22, 4  ;;  %s2355_s23 = int_to_ptr.vmem [resolvable:$true] %s2354_s23 }
 0x1a5   : > { %1237 = vrot.lane.b32.xlu1 %v4210_v58, %s2748_s10  ;;  %v1557_v58 = vld [vmem:[#allocation2 + $0x39] sm:$0xff] }
 0x1a6   : > { %1241 = vrot.lane.b32.xlu0 %v4211_v51, %s2748_s10  ;;  %v1363_v51 = vld [vmem:[#allocation2 + $0x30] sm:$0xff] }
 0x1a7   : > { %v896_v30 = vpop.permute.xlu1 %895 }
 0x1a8   : > { %968 = vst.msk [vmem:[#allocation3 + $0xc0] sm:$0xff] %vm943_vm4, %v896_v30  ;;  %v900_v62 = vpop.permute.xlu0 %899  ;;  %1233 = vrot.lane.b32.xlu2 %v4212_v4, %s2748_s10  ;;  %v1750_v4 = vld [vmem:[#allocation2 + $0x3a] sm:$0xff] }
 0x1a9   : > { %970 = vst.msk [vmem:[#allocation3 + $0xd0] sm:$0xff] %vm943_vm4, %v900_v62 }
 0x1aa   : > { %v910_v6 = vpop.permute.xlu2 %909 }
 0x1ab   : > { %975 = vst.msk [vmem:[#allocation3 + $0xf8] sm:$0xff] %vm943_vm4, %v910_v6 }
 0x1ad   : > { %1243 = vrot.lane.b32.xlu1 %v4213_v61, %s2748_s10  ;;  %v1364_v61 = vld [vmem:[#allocation2 + $0x38] sm:$0xff] }
 0x1ae   : > { %1247 = vrot.lane.b32.xlu0 %v4214_v1, %s2748_s10 }
 0x1af   : > { %v902_v22 = vpop.permute.xlu1 %901 }
 0x1b0   : > { %971 = vst.msk [vmem:[#allocation3 + $0xd8] sm:$0xff] %vm943_vm4, %v902_v22  ;;  %v906_v39 = vpop.permute.xlu0 %905  ;;  %1239 = vrot.lane.b32.xlu2 %v4215_v8, %s2748_s10 }
 0x1b1   : > { %973 = vst.msk [vmem:[#allocation3 + $0xe8] sm:$0xff] %vm943_vm4, %v906_v39  ;;  %v1558_v39 = vld [vmem:[#allocation2 + $0x49] sm:$0xff] }
 0x1b2   : > { %v1045_v13 = vpop.permute.xlu2 %1044 }
 0x1b3   : > { %1139 = vst.msk [vmem:[#allocation3 + $0x10] sm:$0xff] %vm1136_vm5, %v1045_v13  ;;  %v1751_v13 = vld [vmem:[#allocation2 + $0x4a] sm:$0xff] }
 0x1b5   : > { %1249 = vrot.lane.b32.xlu1 %v4216_v5, %s2748_s10  ;;  %v1365_v5 = vld [vmem:[#allocation2 + $0x48] sm:$0xff] }
 0x1b6   : > { %1253 = vrot.lane.b32.xlu0 %v4217_v9, %s2748_s10 }
 0x1b7   : > { %v908_v18 = vpop.permute.xlu1 %907 }
 0x1b8   : > { %974 = vst.msk [vmem:[#allocation3 + $0xf0] sm:$0xff] %vm943_vm4, %v908_v18  ;;  %v1041_v7 = vpop.permute.xlu0 %1040  ;;  %1245 = vrot.lane.b32.xlu2 %v4218_v42, %s2748_s10  ;;  %v1757_v18 = vld [vmem:[#allocation2 + $0x92] sm:$0xff] }
 0x1b9   : > { %1137 = vst.msk [vmem:[#allocation3] sm:$0xff] %vm1136_vm5, %v1041_v7  ;;  %v1564_v42 = vld [vmem:[#allocation2 + $0x91] sm:$0xff] }
 0x1ba   : > { %v1051_v45 = vpop.permute.xlu2 %1050 }
 0x1bb   : > { %1142 = vst.msk [vmem:[#allocation3 + $0x28] sm:$0xff] %vm1136_vm5, %v1051_v45 }
 0x1bd   : > { %1255 = vrot.lane.b32.xlu1 %v4219_v10, %s2748_s10 }
 0x1be   : > { %1259 = vrot.lane.b32.xlu0 %v4220_v3, %s2748_s10  ;;  %v1559_v3 = vld [vmem:[#allocation2 + $0x51] sm:$0xff] }
 0x1bf   : > { %v1043_v11 = vpop.permute.xlu1 %1042 }
 0x1c0   : > { %1138 = vst.msk [vmem:[#allocation3 + $0x8] sm:$0xff] %vm1136_vm5, %v1043_v11  ;;  %v1047_v0 = vpop.permute.xlu0 %1046  ;;  %1251 = vrot.lane.b32.xlu2 %v4221_v15, %s2748_s10 }
 0x1c1   : > { %1140 = vst.msk [vmem:[#allocation3 + $0x18] sm:$0xff] %vm1136_vm5, %v1047_v0  ;;  %v1366_v0 = vld [vmem:[#allocation2 + $0x50] sm:$0xff] }
 0x1c2   : > { %v1057_v28 = vpop.permute.xlu2 %1056 }
 0x1c3   : > { %1145 = vst.msk [vmem:[#allocation3 + $0x40] sm:$0xff] %vm1136_vm5, %v1057_v28  ;;  %v1752_v28 = vld [vmem:[#allocation2 + $0x52] sm:$0xff] }
 0x1c5   : > { %1261 = vrot.lane.b32.xlu1 %v4222_v33, %s2748_s10 }
 0x1c6   : > { %1265 = vrot.lane.b32.xlu0 %v4223_v17, %s2748_s10  ;;  %v1572_v17 = vld [vmem:[#allocation2 + $0xf1] sm:$0xff] }
 0x1c7   : > { %v1049_v34 = vpop.permute.xlu1 %1048 }
 0x1c8   : > { %1141 = vst.msk [vmem:[#allocation3 + $0x20] sm:$0xff] %vm1136_vm5, %v1049_v34  ;;  %v1053_v20 = vpop.permute.xlu0 %1052  ;;  %1257 = vrot.lane.b32.xlu2 %v4224_v26, %s2748_s10  ;;  %v1565_v34 = vld [vmem:[#allocation2 + $0x99] sm:$0xff] }
 0x1c9   : > { %1143 = vst.msk [vmem:[#allocation3 + $0x30] sm:$0xff] %vm1136_vm5, %v1053_v20  ;;  %v1765_v26 = vld [vmem:[#allocation2 + $0xf2] sm:$0xff] }
 0x1ca   : > { %v1063_v40 = vpop.permute.xlu2 %1062 }
 0x1cb   : > { %1148 = vst.msk [vmem:[#allocation3 + $0x58] sm:$0xff] %vm1136_vm5, %v1063_v40 }
 0x1cd   : > { %1267 = vrot.lane.b32.xlu1 %v4225_v24, %s2748_s10  ;;  %v1373_v24 = vld [vmem:[#allocation2 + $0xa8] sm:$0xff] }
 0x1ce   : > { %1271 = vrot.lane.b32.xlu0 %v4226_v32, %s2748_s10  ;;  %v1758_v32 = vld [vmem:[#allocation2 + $0x9a] sm:$0xff] }
 0x1cf   : > { %v1055_v46 = vpop.permute.xlu1 %1054 }
 0x1d0   : > { %1144 = vst.msk [vmem:[#allocation3 + $0x38] sm:$0xff] %vm1136_vm5, %v1055_v46  ;;  %v1059_v31 = vpop.permute.xlu0 %1058  ;;  %1263 = vrot.lane.b32.xlu2 %v4227_v38, %s2748_s10  ;;  %v1560_v38 = vld [vmem:[#allocation2 + $0x61] sm:$0xff] }
 0x1d1   : > { %1146 = vst.msk [vmem:[#allocation3 + $0x48] sm:$0xff] %vm1136_vm5, %v1059_v31 }
 0x1d2   : > { %v1069_v50 = vpop.permute.xlu2 %1068 }
 0x1d3   : > { %1151 = vst.msk [vmem:[#allocation3 + $0x70] sm:$0xff] %vm1136_vm5, %v1069_v50 }
 0x1d5   : > { %1273 = vrot.lane.b32.xlu1 %v4228_v37, %s2748_s10  ;;  %v1367_v37 = vld [vmem:[#allocation2 + $0x60] sm:$0xff] }
 0x1d6   : > { %1277 = vrot.lane.b32.xlu0 %v4229_v44, %s2748_s10 }
 0x1d7   : > { %v1061_v54 = vpop.permute.xlu1 %1060 }
 0x1d8   : > { %1147 = vst.msk [vmem:[#allocation3 + $0x50] sm:$0xff] %vm1136_vm5, %v1061_v54  ;;  %v1065_v43 = vpop.permute.xlu0 %1064  ;;  %1269 = vrot.lane.b32.xlu2 %v4230_v49, %s2748_s10 }
 0x1d9   : > { %1149 = vst.msk [vmem:[#allocation3 + $0x60] sm:$0xff] %vm1136_vm5, %v1065_v43  ;;  %v1753_v43 = vld [vmem:[#allocation2 + $0x62] sm:$0xff] }
 0x1da   : > { %v1075_v57 = vpop.permute.xlu2 %1074 }
 0x1db   : > { %1154 = vst.msk [vmem:[#allocation3 + $0x88] sm:$0xff] %vm1136_vm5, %v1075_v57  ;;  %v1573_v57 = vld [vmem:[#allocation2 + $0xf9] sm:$0xff] }
 0x1dd   : > { %1279 = vrot.lane.b32.xlu1 %v4231_v48, %s2748_s10  ;;  %v1566_v48 = vld [vmem:[#allocation2 + $0xa9] sm:$0xff] }
 0x1de   : > { %1283 = vrot.lane.b32.xlu0 %v3376_v27, %s2748_s10 }
 0x1df   : > { %v1067_v53 = vpop.permute.xlu1 %1066 }
 0x1e0   : > { %1150 = vst.msk [vmem:[#allocation3 + $0x68] sm:$0xff] %vm1136_vm5, %v1067_v53  ;;  %v1071_v60 = vpop.permute.xlu0 %1070  ;;  %1275 = vrot.lane.b32.xlu2 %v4232_v52, %s2748_s10 }
 0x1e1   : > { %1152 = vst.msk [vmem:[#allocation3 + $0x78] sm:$0xff] %vm1136_vm5, %v1071_v60  ;;  %v1766_v60 = vld [vmem:[#allocation2 + $0xfa] sm:$0xff] }
 0x1e2   : > { %v1081_v12 = vpop.permute.xlu2 %1080 }
 0x1e3   : > { %1157 = vst.msk [vmem:[#allocation3 + $0xa0] sm:$0xff] %vm1136_vm5, %v1081_v12  ;;  %v1374_v12 = vld [vmem:[#allocation2 + $0xb0] sm:$0xff] }
 0x1e5   : > { %1285 = vrot.lane.b32.xlu1 %v4233_v56, %s2748_s10  ;;  %v1759_v56 = vld [vmem:[#allocation2 + $0xaa] sm:$0xff] }
 0x1e6   : > { %1289 = vrot.lane.b32.xlu0 %v3391_v29, %s2748_s10 }
 0x1e7   : > { %v1073_v2 = vpop.permute.xlu1 %1072 }
 0x1e8   : > { %1153 = vst.msk [vmem:[#allocation3 + $0x80] sm:$0xff] %vm1136_vm5, %v1073_v2  ;;  %v1077_v27 = vpop.permute.xlu0 %1076  ;;  %1281 = vrot.lane.b32.xlu2 %v4234_v19, %s2748_s10  ;;  %v1561_v19 = vld [vmem:[#allocation2 + $0x69] sm:$0xff] }
 0x1e9   : > { %1155 = vst.msk [vmem:[#allocation3 + $0x90] sm:$0xff] %vm1136_vm5, %v1077_v27 }
 0x1ea   : > { %v1087_v55 = vpop.permute.xlu2 %1086 }
 0x1eb   : > { %1160 = vst.msk [vmem:[#allocation3 + $0xb8] sm:$0xff] %vm1136_vm5, %v1087_v55 }
 0x1ed   : > { %1291 = vrot.lane.b32.xlu1 %v4235_v59, %s2748_s10  ;;  %v1368_v59 = vld [vmem:[#allocation2 + $0x68] sm:$0xff] }
 0x1ee   : > { %1620 = vrot.lane.b32.xlu0 %v1556_v16, %s2749_s11  ;;  %v1381_v16 = vld [vmem:[#allocation2 + $0x108] sm:$0xff] }
 0x1ef   : > { %v1079_v29 = vpop.permute.xlu1 %1078 }
 0x1f0   : > { %1156 = vst.msk [vmem:[#allocation3 + $0x98] sm:$0xff] %vm1136_vm5, %v1079_v29  ;;  %v1083_v21 = vpop.permute.xlu0 %1082  ;;  %1287 = vrot.lane.b32.xlu2 %v4236_v14, %s2748_s10  ;;  %v1978_v29 = vld [vmem:[%s4141_s1 + $0x20] sm:$0xf] }
 0x1f1   : > { %1158 = vst.msk [vmem:[#allocation3 + $0xa8] sm:$0xff] %vm1136_vm5, %v1083_v21  ;;  %2505 = vmatpush.msk.msra.mxu0 %vm2076_vm7, %v1978_v29  ;;  %2545 = vmatpush.msk.msra.mxu1 %vm2076_vm7, %v1978_v29 }
 0x1f2   : > { %v1093_v23 = vpop.permute.xlu2 %1092  ;;  %2546 = vmatpush.msk.msra.mxu2 %vm2076_vm7, %v1978_v29  ;;  %2547 = vmatpush.msk.msra.mxu3 %vm2076_vm7, %v1978_v29 }
 0x1f3   : > { %1163 = vst.msk [vmem:[#allocation3 + $0xd0] sm:$0xff] %vm1136_vm5, %v1093_v23  ;;  %v1976_v23 = vld [vmem:[%s4141_s1 + $0x10] sm:$0xff] }
 0x1f5   : > { %1813 = vrot.lane.b32.xlu1 %v1749_v35, %s2750_s12  ;;  %v1977_v35 = vld [vmem:[%s4141_s1 + $0x18] sm:$0xff] }
 0x1f6   : > { %1622 = vrot.lane.b32.xlu0 %v1557_v58, %s2749_s11  ;;  %2092 = vmatpush.msra.mxu0 %v1977_v35 }
 0x1f7   : > { %v1085_v30 = vpop.permute.xlu1 %1084  ;;  %2548 = vmatpush.msra.mxu1 %v1977_v35  ;;  %2549 = vmatpush.msra.mxu2 %v1977_v35 }
 0x1f8   : > { %1159 = vst.msk [vmem:[#allocation3 + $0xb0] sm:$0xff] %vm1136_vm5, %v1085_v30  ;;  %v1089_v62 = vpop.permute.xlu0 %1088  ;;  %1427 = vrot.lane.b32.xlu2 %v1363_v51, %s2751_s13  ;;  %v1975_v51 = vld [vmem:[%s4141_s1 + $0x8] sm:$0xff]  ;;  %2550 = vmatpush.msra.mxu3 %v1977_v35  ;;  %v1760_v30 = vld [vmem:[#allocation2 + $0xb2] sm:$0xff] }
 0x1f9   : > { %1161 = vst.msk [vmem:[#allocation3 + $0xc0] sm:$0xff] %vm1136_vm5, %v1089_v62  ;;  %2093 = vmatpush.msra.mxu0 %v1976_v23  ;;  %2551 = vmatpush.msra.mxu1 %v1976_v23  ;;  %v1567_v62 = vld [vmem:[#allocation2 + $0xb1] sm:$0xff]  ;;  %v1769_v35 = vld [vmem:[#allocation2 + $0x122] sm:$0xff] }
 0x1fa   : > { %v1099_v6 = vpop.permute.xlu2 %1098  ;;  %2552 = vmatpush.msra.mxu2 %v1976_v23  ;;  %2553 = vmatpush.msra.mxu3 %v1976_v23  ;;  %v1756_v23 = vld [vmem:[#allocation2 + $0x82] sm:$0xff] }
 0x1fb   : > { %1166 = vst.msk [vmem:[#allocation3 + $0xe8] sm:$0xff] %vm1136_vm5, %v1099_v6  ;;  %2094 = vmatpush.msra.mxu0 %v1975_v51  ;;  %2554 = vmatpush.msra.mxu1 %v1975_v51 }
 0x1fc   : > { %2555 = vmatpush.msra.mxu2 %v1975_v51  ;;  %2556 = vmatpush.msra.mxu3 %v1975_v51 }
 0x1fd   : > { %1815 = vrot.lane.b32.xlu1 %v1750_v4, %s2750_s12  ;;  %v1974_v4 = vld [vmem:[%s4141_s1] sm:$0xff] }
 0x1fe   : > { %1443 = vrot.lane.b32.xlu0 %v3207_v36, %s2751_s13  ;;  %2095 = vmatpush.msra.mxu0 %v1974_v4 }
 0x1ff   : > { %v1091_v1 = vpop.permute.xlu1 %1090  ;;  %2557 = vmatpush.msra.mxu1 %v1974_v4  ;;  %2558 = vmatpush.msra.mxu2 %v1974_v4 }
 0x200   : > { %1162 = vst.msk [vmem:[#allocation3 + $0xc8] sm:$0xff] %vm1136_vm5, %v1091_v1  ;;  %v1095_v22 = vpop.permute.xlu0 %1094  ;;  %1429 = vrot.lane.b32.xlu2 %v1364_v61, %s2751_s13  ;;  %2559 = vmatpush.msra.mxu3 %v1974_v4 }
 0x201   : > { %1164 = vst.msk [vmem:[#allocation3 + $0xd8] sm:$0xff] %vm1136_vm5, %v1095_v22  ;;  %v1767_v22 = vld [vmem:[#allocation2 + $0x10a] sm:$0xff] }
 0x202   : > { %v1234_v8 = vpop.permute.xlu2 %1233 }
 0x203   : > { %1330 = vst.msk [vmem:[#allocation3] sm:$0xff] %vm1329_vm6, %v1234_v8 }
 0x205   : > { %1624 = vrot.lane.b32.xlu1 %v1558_v39, %s2749_s11  ;;  %v1754_v39 = vld [vmem:[#allocation2 + $0x6a] sm:$0xff] }
 0x206   : > { %1817 = vrot.lane.b32.xlu0 %v1751_v13, %s2750_s12 }
 0x207   : > { %v1097_v36 = vpop.permute.xlu1 %1096 }
 0x208   : > { %1165 = vst.msk [vmem:[#allocation3 + $0xe0] sm:$0xff] %vm1136_vm5, %v1097_v36  ;;  %v1101_v9 = vpop.permute.xlu0 %1100  ;;  %1431 = vrot.lane.b32.xlu2 %v1365_v5, %s2751_s13  ;;  %v1773_v5 = vld [vmem:[#allocation2 + $0x152] sm:$0xff] }
 0x209   : > { %1167 = vst.msk [vmem:[#allocation3 + $0xf0] sm:$0xff] %vm1136_vm5, %v1101_v9  ;;  %v1375_v9 = vld [vmem:[#allocation2 + $0xc0] sm:$0xff] }
 0x20a   : > { %v1240_v7 = vpop.permute.xlu2 %1239 }
 0x20b   : > { %1333 = vst.msk [vmem:[#allocation3 + $0x18] sm:$0xff] %vm1329_vm6, %v1240_v7 }
 0x20d   : > { %1829 = vrot.lane.b32.xlu1 %v1757_v18, %s2750_s12  ;;  %v1580_v18 = vld [vmem:[#allocation2 + $0x151] sm:$0xff] }
 0x20e   : > { %1445 = vrot.lane.b32.xlu0 %v3224_v47, %s2751_s13 }
 0x20f   : > { %v1103_v45 = vpop.permute.xlu1 %1102 }
 0x210   : > { %1168 = vst.msk [vmem:[#allocation3 + $0xf8] sm:$0xff] %vm1136_vm5, %v1103_v45  ;;  %v1236_v10 = vpop.permute.xlu0 %1235  ;;  %1636 = vrot.lane.b32.xlu2 %v1564_v42, %s2749_s11  ;;  %v1562_v45 = vld [vmem:[#allocation2 + $0x79] sm:$0xff] }
 0x211   : > { %1331 = vst.msk [vmem:[#allocation3 + $0x8] sm:$0xff] %vm1329_vm6, %v1236_v10 }
 0x212   : > { %v1246_v11 = vpop.permute.xlu2 %1245 }
 0x213   : > { %1336 = vst.msk [vmem:[#allocation3 + $0x30] sm:$0xff] %vm1329_vm6, %v1246_v11  ;;  %v1369_v11 = vld [vmem:[#allocation2 + $0x78] sm:$0xff] }
 0x215   : > { %1626 = vrot.lane.b32.xlu1 %v1559_v3, %s2749_s11  ;;  %v1382_v3 = vld [vmem:[#allocation2 + $0x110] sm:$0xff] }
 0x216   : > { %1459 = vrot.lane.b32.xlu0 %v3256_v41, %s2751_s13 }
 0x217   : > { %v1238_v15 = vpop.permute.xlu1 %1237 }
 0x218   : > { %1332 = vst.msk [vmem:[#allocation3 + $0x10] sm:$0xff] %vm1329_vm6, %v1238_v15  ;;  %v1242_v47 = vpop.permute.xlu0 %1241  ;;  %1433 = vrot.lane.b32.xlu2 %v1366_v0, %s2751_s13 }
 0x219   : > { %1334 = vst.msk [vmem:[#allocation3 + $0x20] sm:$0xff] %vm1329_vm6, %v1242_v47  ;;  %v1388_v47 = vld [vmem:[#allocation2 + $0x158] sm:$0xff] }
 0x21a   : > { %v1252_v33 = vpop.permute.xlu2 %1251 }
 0x21b   : > { %1339 = vst.msk [vmem:[#allocation3 + $0x48] sm:$0xff] %vm1329_vm6, %v1252_v33  ;;  %v1761_v33 = vld [vmem:[#allocation2 + $0xc2] sm:$0xff] }
 0x21d   : > { %1819 = vrot.lane.b32.xlu1 %v1752_v28, %s2750_s12 }
 0x21e   : > { %1652 = vrot.lane.b32.xlu0 %v1572_v17, %s2749_s11  ;;  %v1568_v17 = vld [vmem:[#allocation2 + $0xc1] sm:$0xff] }
 0x21f   : > { %v1244_v20 = vpop.permute.xlu1 %1243 }
 0x220   : > { %1335 = vst.msk [vmem:[#allocation3 + $0x28] sm:$0xff] %vm1329_vm6, %v1244_v20  ;;  %v1248_v41 = vpop.permute.xlu0 %1247  ;;  %1638 = vrot.lane.b32.xlu2 %v1565_v34, %s2749_s11 }
 0x221   : > { %1337 = vst.msk [vmem:[#allocation3 + $0x38] sm:$0xff] %vm1329_vm6, %v1248_v41 }
 0x222   : > { %v1258_v40 = vpop.permute.xlu2 %1257 }
 0x223   : > { %1342 = vst.msk [vmem:[#allocation3 + $0x60] sm:$0xff] %vm1329_vm6, %v1258_v40 }
 0x225   : > { %1845 = vrot.lane.b32.xlu1 %v1765_v26, %s2750_s12  ;;  %v1575_v26 = vld [vmem:[#allocation2 + $0x111] sm:$0xff] }
 0x226   : > { %1447 = vrot.lane.b32.xlu0 %v1373_v24, %s2751_s13  ;;  %v1768_v24 = vld [vmem:[#allocation2 + $0x112] sm:$0xff] }
 0x227   : > { %v1250_v46 = vpop.permute.xlu1 %1249 }
 0x228   : > { %1338 = vst.msk [vmem:[#allocation3 + $0x40] sm:$0xff] %vm1329_vm6, %v1250_v46  ;;  %v1254_v31 = vpop.permute.xlu0 %1253  ;;  %1831 = vrot.lane.b32.xlu2 %v1758_v32, %s2750_s12  ;;  %v1755_v32 = vld [vmem:[#allocation2 + $0x7a] sm:$0xff] }
 0x229   : > { %1340 = vst.msk [vmem:[#allocation3 + $0x50] sm:$0xff] %vm1329_vm6, %v1254_v31 }
 0x22a   : > { %v1264_v50 = vpop.permute.xlu2 %1263 }
 0x22b   : > { %1345 = vst.msk [vmem:[#allocation3 + $0x78] sm:$0xff] %vm1329_vm6, %v1264_v50  ;;  %v1774_v50 = vld [vmem:[#allocation2 + $0x15a] sm:$0xff] }
 0x22d   : > { %1628 = vrot.lane.b32.xlu1 %v1560_v38, %s2749_s11 }
 0x22e   : > { %1461 = vrot.lane.b32.xlu0 %v3286_v63, %s2751_s13 }
 0x22f   : > { %v1256_v44 = vpop.permute.xlu1 %1255 }
 0x230   : > { %1341 = vst.msk [vmem:[#allocation3 + $0x58] sm:$0xff] %vm1329_vm6, %v1256_v44  ;;  %v1260_v54 = vpop.permute.xlu0 %1259  ;;  %1435 = vrot.lane.b32.xlu2 %v1367_v37, %s2751_s13  ;;  %v1376_v44 = vld [vmem:[#allocation2 + $0xc8] sm:$0xff] }
 0x231   : > { %1343 = vst.msk [vmem:[#allocation3 + $0x68] sm:$0xff] %vm1329_vm6, %v1260_v54  ;;  %v1581_v54 = vld [vmem:[#allocation2 + $0x159] sm:$0xff] }
 0x232   : > { %v1270_v49 = vpop.permute.xlu2 %1269 }
 0x233   : > { %1348 = vst.msk [vmem:[#allocation3 + $0x90] sm:$0xff] %vm1329_vm6, %v1270_v49 }
 0x235   : > { %1821 = vrot.lane.b32.xlu1 %v1753_v43, %s2750_s12 }
 0x236   : > { %1654 = vrot.lane.b32.xlu0 %v1573_v57, %s2749_s11 }
 0x237   : > { %v1262_v53 = vpop.permute.xlu1 %1261 }
 0x238   : > { %1344 = vst.msk [vmem:[#allocation3 + $0x70] sm:$0xff] %vm1329_vm6, %v1262_v53  ;;  %v1266_v63 = vpop.permute.xlu0 %1265  ;;  %1640 = vrot.lane.b32.xlu2 %v1566_v48, %s2749_s11  ;;  %v1563_v48 = vld [vmem:[#allocation2 + $0x81] sm:$0xff] }
 0x239   : > { %1346 = vst.msk [vmem:[#allocation3 + $0x80] sm:$0xff] %vm1329_vm6, %v1266_v63  ;;  %v1383_v63 = vld [vmem:[#allocation2 + $0x120] sm:$0xff] }
 0x23a   : > { %v1276_v52 = vpop.permute.xlu2 %1275 }
 0x23b   : > { %1351 = vst.msk [vmem:[#allocation3 + $0xa8] sm:$0xff] %vm1329_vm6, %v1276_v52 }
 0x23d   : > { %1847 = vrot.lane.b32.xlu1 %v1766_v60, %s2750_s12  ;;  %v1370_v60 = vld [vmem:[#allocation2 + $0x80] sm:$0xff] }
 0x23e   : > { %1449 = vrot.lane.b32.xlu0 %v1374_v12, %s2751_s13 }
 0x23f   : > { %v1268_v2 = vpop.permute.xlu1 %1267 }
 0x240   : > { %1347 = vst.msk [vmem:[#allocation3 + $0x88] sm:$0xff] %vm1329_vm6, %v1268_v2  ;;  %v1272_v27 = vpop.permute.xlu0 %1271  ;;  %1833 = vrot.lane.b32.xlu2 %v1759_v56, %s2750_s12  ;;  %v1389_v2 = vld [vmem:[#allocation2 + $0x168] sm:$0xff] }
 0x241   : > { %1349 = vst.msk [vmem:[#allocation3 + $0x98] sm:$0xff] %vm1329_vm6, %v1272_v27 }
 0x242   : > { %v1282_v55 = vpop.permute.xlu2 %1281 }
 0x243   : > { %1354 = vst.msk [vmem:[#allocation3 + $0xc0] sm:$0xff] %vm1329_vm6, %v1282_v55  ;;  %v1569_v55 = vld [vmem:[#allocation2 + $0xc9] sm:$0xff] }
 0x245   : > { %1630 = vrot.lane.b32.xlu1 %v1561_v19, %s2749_s11  ;;  %v1762_v19 = vld [vmem:[#allocation2 + $0xca] sm:$0xff] }
 0x246   : > { %1463 = vrot.lane.b32.xlu0 %v1381_v16, %s2751_s13 }
 0x247   : > { %v1274_v21 = vpop.permute.xlu1 %1273 }
 0x248   : > { %1350 = vst.msk [vmem:[#allocation3 + $0xa0] sm:$0xff] %vm1329_vm6, %v1274_v21  ;;  %v1278_v14 = vpop.permute.xlu0 %1277  ;;  %1437 = vrot.lane.b32.xlu2 %v1368_v59, %s2751_s13  ;;  %v1576_v21 = vld [vmem:[#allocation2 + $0x121] sm:$0xff] }
 0x249   : > { %1352 = vst.msk [vmem:[#allocation3 + $0xb0] sm:$0xff] %vm1329_vm6, %v1278_v14 }
 0x24a   : > { %v1288_v58 = vpop.permute.xlu2 %1287 }
 0x24b   : > { %1357 = vst.msk [vmem:[#allocation3 + $0xd8] sm:$0xff] %vm1329_vm6, %v1288_v58 }
 0x24d   : > { %1475 = vrot.lane.b32.xlu1 %v3357_v25, %s2751_s13  ;;  %v1574_v25 = vld [vmem:[#allocation2 + $0x109] sm:$0xff] }
 0x24e   : > { %1835 = vrot.lane.b32.xlu0 %v1760_v30, %s2750_s12 }
 0x24f   : > { %v1280_v6 = vpop.permute.xlu1 %1279 }
 0x250   : > { %1353 = vst.msk [vmem:[#allocation3 + $0xb8] sm:$0xff] %vm1329_vm6, %v1280_v6  ;;  %v1284_v61 = vpop.permute.xlu0 %1283  ;;  %1642 = vrot.lane.b32.xlu2 %v1567_v62, %s2749_s11  ;;  %v1775_v62 = vld [vmem:[#allocation2 + $0x16a] sm:$0xff]  ;;  %v1570_v6 = vld [vmem:[#allocation2 + $0xd9] sm:$0xff] }
 0x251   : > { %1355 = vst.msk [vmem:[#allocation3 + $0xc8] sm:$0xff] %vm1329_vm6, %v1284_v61  ;;  %v1582_v61 = vld [vmem:[#allocation2 + $0x169] sm:$0xff] }
 0x252   : > { %v1428_v1 = vpop.permute.xlu2 %1427 }
 0x253   : > { %1524 = vst.msk [vmem:[#allocation3] sm:$0xff] %vm1523_vm8, %v1428_v1 }
 0x255   : > { %1656 = vrot.lane.b32.xlu1 %v1574_v25, %s2749_s11 }
 0x256   : > { %1849 = vrot.lane.b32.xlu0 %v1767_v22, %s2750_s12 }
 0x257   : > { %v1286_v8 = vpop.permute.xlu1 %1285 }
 0x258   : > { %1356 = vst.msk [vmem:[#allocation3 + $0xd0] sm:$0xff] %vm1329_vm6, %v1286_v8  ;;  %v1290_v13 = vpop.permute.xlu0 %1289  ;;  %1823 = vrot.lane.b32.xlu2 %v1754_v39, %s2750_s12  ;;  %v1384_v39 = vld [vmem:[#allocation2 + $0x128] sm:$0xff] }
 0x259   : > { %1358 = vst.msk [vmem:[#allocation3 + $0xe0] sm:$0xff] %vm1329_vm6, %v1290_v13 }
 0x25a   : > { %v1430_v36 = vpop.permute.xlu2 %1429 }
 0x25b   : > { %1525 = vst.msk [vmem:[#allocation3 + $0x8] sm:$0xff] %vm1523_vm8, %v1430_v36  ;;  %v1377_v36 = vld [vmem:[#allocation2 + $0xd8] sm:$0xff] }
 0x25d   : > { %1861 = vrot.lane.b32.xlu1 %v1773_v5, %s2750_s12  ;;  %v1763_v5 = vld [vmem:[#allocation2 + $0xda] sm:$0xff] }
 0x25e   : > { %1451 = vrot.lane.b32.xlu0 %v1375_v9, %s2751_s13 }
 0x25f   : > { %v1292_v7 = vpop.permute.xlu1 %1291 }
 0x260   : > { %1359 = vst.msk [vmem:[#allocation3 + $0xe8] sm:$0xff] %vm1329_vm6, %v1292_v7  ;;  %v1621_v42 = vpop.permute.xlu0 %1620  ;;  %1668 = vrot.lane.b32.xlu2 %v1580_v18, %s2749_s11  ;;  %v1577_v7 = vld [vmem:[#allocation2 + $0x129] sm:$0xff] }
 0x261   : > { %1717 = vst.msk [vmem:[#allocation3] sm:$0xff] %vm1716_vm9, %v1621_v42 }
 0x262   : > { %v1432_v10 = vpop.permute.xlu2 %1431 }
 0x263   : > { %1526 = vst.msk [vmem:[#allocation3 + $0x10] sm:$0xff] %vm1523_vm8, %v1432_v10  ;;  %v1390_v10 = vld [vmem:[#allocation2 + $0x170] sm:$0xff] }
 0x265   : > { %1632 = vrot.lane.b32.xlu1 %v1562_v45, %s2749_s11  ;;  %v1770_v45 = vld [vmem:[#allocation2 + $0x12a] sm:$0xff] }
 0x266   : > { %1465 = vrot.lane.b32.xlu0 %v1382_v3, %s2751_s13 }
 0x267   : > { %v1814_v0 = vpop.permute.xlu1 %1813 }
 0x268   : > { %1910 = vst.msk [vmem:[#allocation3] sm:$0xff] %vm1909_vm10, %v1814_v0  ;;  %v1623_v15 = vpop.permute.xlu0 %1622  ;;  %1439 = vrot.lane.b32.xlu2 %v1369_v11, %s2751_s13 }
 0x269   : > { %1718 = vst.msk [vmem:[#allocation3 + $0x8] sm:$0xff] %vm1716_vm9, %v1623_v15  ;;  %v1776_v15 = vld [vmem:[#allocation2 + $0x172] sm:$0xff] }
 0x26a   : > { %v1637_v28 = vpop.permute.xlu2 %1636 }
 0x26d   : > { %1477 = vrot.lane.b32.xlu1 %v1388_v47, %s2751_s13 }
 0x26e   : > { %1837 = vrot.lane.b32.xlu0 %v1761_v33, %s2750_s12  ;;  %v1583_v33 = vld [vmem:[#allocation2 + $0x171] sm:$0xff] }
 0x26f   : > { %v1816_v34 = vpop.permute.xlu1 %1815  ;;  %v1942_v20 = vld [vmem:[#allocation3] sm:$0xff] }
 0x270   : > { %1911 = vst.msk [vmem:[#allocation3 + $0x8] sm:$0xff] %vm1909_vm10, %v1816_v34  ;;  %2506 = vmatmul.msk.f32.vlgmr.msra.gmra.mxu0 %vm1979_vm11, %v1942_v20  ;;  %v1444_v41 = vpop.permute.xlu0 %1443  ;;  %1644 = vrot.lane.b32.xlu2 %v1568_v17, %s2749_s11 }
 0x271   : > { %1532 = vst.msk [vmem:[#allocation3 + $0x40] sm:$0xff] %vm1523_vm8, %v1444_v41  ;;  %v1385_v41 = vld [vmem:[#allocation2 + $0x138] sm:$0xff] }
 0x272   : > { %1725 = vst.msk [vmem:[#allocation3 + $0x40] sm:$0xff] %vm1716_vm9, %v1637_v28  ;;  %v1434_v40 = vpop.permute.xlu2 %1433  ;;  %v1571_v28 = vld [vmem:[#allocation2 + $0xe1] sm:$0xff] }
 0x273   : > { %1527 = vst.msk [vmem:[#allocation3 + $0x18] sm:$0xff] %vm1523_vm8, %v1434_v40  ;;  %v1764_v40 = vld [vmem:[#allocation2 + $0xe2] sm:$0xff] }
 0x275   : > { %1658 = vrot.lane.b32.xlu1 %v1575_v26, %s2749_s11 }
 0x276   : > { %1851 = vrot.lane.b32.xlu0 %v1768_v24, %s2750_s12  ;;  %v1378_v24 = vld [vmem:[#allocation2 + $0xe0] sm:$0xff] }
 0x277   : > { %v1625_v46 = vpop.permute.xlu1 %1624  ;;  %v1943_v31 = vld [vmem:[#allocation3 + $0x8] sm:$0xff] }
 0x278   : > { %1719 = vst.msk [vmem:[#allocation3 + $0x10] sm:$0xff] %vm1716_vm9, %v1625_v46  ;;  %2507 = vmatmul.msk.f32.gmra.mxu0 %vm1979_vm11, %v1943_v31  ;;  %v1818_v38 = vpop.permute.xlu0 %1817  ;;  %1825 = vrot.lane.b32.xlu2 %v1755_v32, %s2750_s12 }
 0x279   : > { %1912 = vst.msk [vmem:[#allocation3 + $0x10] sm:$0xff] %vm1909_vm10, %v1818_v38  ;;  %v1578_v38 = vld [vmem:[#allocation2 + $0x139] sm:$0xff] }
 0x27a   : > { %v1639_v37 = vpop.permute.xlu2 %1638 }
 0x27d   : > { %1863 = vrot.lane.b32.xlu1 %v1774_v50, %s2750_s12 }
 0x27e   : > { %1453 = vrot.lane.b32.xlu0 %v1376_v44, %s2751_s13  ;;  %v1391_v44 = vld [vmem:[#allocation2 + $0x180] sm:$0xff] }
 0x27f   : > { %v1830_v43 = vpop.permute.xlu1 %1829 }
 0x280   : > { %1918 = vst.msk [vmem:[#allocation3 + $0x40] sm:$0xff] %vm1909_vm10, %v1830_v43  ;;  %v1446_v49 = vpop.permute.xlu0 %1445  ;;  %v1944_v57 = vld [vmem:[#allocation3 + $0x10] sm:$0xff]  ;;  %1670 = vrot.lane.b32.xlu2 %v1581_v54, %s2749_s11 }
 0x281   : > { %1533 = vst.msk [vmem:[#allocation3 + $0x48] sm:$0xff] %vm1523_vm8, %v1446_v49  ;;  %2508 = vmatmul.msk.f32.gmra.mxu0 %vm1979_vm11, %v1944_v57  ;;  %v1777_v57 = vld [vmem:[#allocation2 + $0x182] sm:$0xff] }
 0x282   : > { %1726 = vst.msk [vmem:[#allocation3 + $0x48] sm:$0xff] %vm1716_vm9, %v1639_v37  ;;  %v1832_v53 = vpop.permute.xlu2 %1831  ;;  %v1771_v37 = vld [vmem:[#allocation2 + $0x13a] sm:$0xff] }
 0x283   : > { %1919 = vst.msk [vmem:[#allocation3 + $0x48] sm:$0xff] %vm1909_vm10, %v1832_v53  ;;  %v1392_v53 = vld [vmem:[#allocation2 + $0x188] sm:$0xff] }
 0x285   : > { %1634 = vrot.lane.b32.xlu1 %v1563_v48, %s2749_s11 }
 0x286   : > { %1467 = vrot.lane.b32.xlu0 %v1383_v63, %s2751_s13  ;;  %v1584_v63 = vld [vmem:[#allocation2 + $0x181] sm:$0xff] }
 0x287   : > { %v1627_v52 = vpop.permute.xlu1 %1626  ;;  %v1950_v12 = vld [vmem:[#allocation3 + $0x40] sm:$0xff] }
 0x288   : > { %1720 = vst.msk [vmem:[#allocation3 + $0x18] sm:$0xff] %vm1716_vm9, %v1627_v52  ;;  %2514 = vmatmul.msk.f32.vlgmr.msra.gmra.mxu1 %vm1979_vm11, %v1950_v12  ;;  %v1460_v56 = vpop.permute.xlu0 %1459  ;;  %1441 = vrot.lane.b32.xlu2 %v1370_v60, %s2751_s13 }
 0x289   : > { %1540 = vst.msk [vmem:[#allocation3 + $0x80] sm:$0xff] %vm1523_vm8, %v1460_v56  ;;  %v1579_v56 = vld [vmem:[#allocation2 + $0x141] sm:$0xff] }
 0x28a   : > { %v1436_v27 = vpop.permute.xlu2 %1435  ;;  %v1951_v16 = vld [vmem:[#allocation3 + $0x48] sm:$0xff] }
 0x28b   : > { %1528 = vst.msk [vmem:[#allocation3 + $0x20] sm:$0xff] %vm1523_vm8, %v1436_v27  ;;  %v1772_v27 = vld [vmem:[#allocation2 + $0x142] sm:$0xff] }
 0x28d   : > { %1479 = vrot.lane.b32.xlu1 %v1389_v2, %s2751_s13 }
 0x28e   : > { %1839 = vrot.lane.b32.xlu0 %v1762_v19, %s2750_s12  ;;  %v1386_v19 = vld [vmem:[#allocation2 + $0x140] sm:$0xff] }
 0x28f   : > { %v1820_v59 = vpop.permute.xlu1 %1819 }
 0x290   : > { %1913 = vst.msk [vmem:[#allocation3 + $0x18] sm:$0xff] %vm1909_vm10, %v1820_v59  ;;  %v1653_v29 = vpop.permute.xlu0 %1652  ;;  %1646 = vrot.lane.b32.xlu2 %v1569_v55, %s2749_s11  ;;  %2515 = vmatmul.msk.f32.gmra.mxu1 %vm1979_vm11, %v1951_v16 }
 0x291   : > { %1733 = vst.msk [vmem:[#allocation3 + $0x80] sm:$0xff] %vm1716_vm9, %v1653_v29  ;;  %v1778_v29 = vld [vmem:[#allocation2 + $0x18a] sm:$0xff] }
 0x292   : > { %v1641_v14 = vpop.permute.xlu2 %1640 }
 0x295   : > { %1660 = vrot.lane.b32.xlu1 %v1576_v21, %s2749_s11 }
 0x296   : > { %1853 = vrot.lane.b32.xlu0 %v1769_v35, %s2750_s12  ;;  %v1585_v35 = vld [vmem:[#allocation2 + $0x189] sm:$0xff] }
 0x297   : > { %v1846_v58 = vpop.permute.xlu1 %1845  ;;  %v1945_v51 = vld [vmem:[#allocation3 + $0x18] sm:$0xff] }
 0x298   : > { %1926 = vst.msk [vmem:[#allocation3 + $0x80] sm:$0xff] %vm1909_vm10, %v1846_v58  ;;  %2509 = vmatmul.msk.f32.gmra.mxu0 %vm1979_vm11, %v1945_v51  ;;  %v1448_v30 = vpop.permute.xlu0 %1447  ;;  %1827 = vrot.lane.b32.xlu2 %v1756_v23, %s2750_s12 }
 0x299   : > { %1534 = vst.msk [vmem:[#allocation3 + $0x50] sm:$0xff] %vm1523_vm8, %v1448_v30  ;;  %v1586_v30 = vld [vmem:[#allocation2 + $0x199] sm:$0xff] }
 0x29a   : > { %1727 = vst.msk [vmem:[#allocation3 + $0x50] sm:$0xff] %vm1716_vm9, %v1641_v14  ;;  %v1834_v4 = vpop.permute.xlu2 %1833  ;;  %v1393_v14 = vld [vmem:[#allocation2 + $0x198] sm:$0xff] }
 0x29b   : > { %1920 = vst.msk [vmem:[#allocation3 + $0x50] sm:$0xff] %vm1909_vm10, %v1834_v4 }
 0x29d   : > { %1865 = vrot.lane.b32.xlu1 %v1775_v62, %s2750_s12 }
 0x29e   : > { %1648 = vrot.lane.b32.xlu0 %v1570_v6, %s2749_s11 }
 0x29f   : > { %v1629_v25 = vpop.permute.xlu1 %1628  ;;  %v1958_v1 = vld [vmem:[#allocation3 + $0x80] sm:$0xff] }
 0x2a0   : > { %1721 = vst.msk [vmem:[#allocation3 + $0x20] sm:$0xff] %vm1716_vm9, %v1629_v25  ;;  %2522 = vmatmul.msk.f32.vlgmr.msra.gmra.mxu2 %vm1979_vm11, %v1958_v1  ;;  %v1462_v22 = vpop.permute.xlu0 %1461  ;;  %1672 = vrot.lane.b32.xlu2 %v1582_v61, %s2749_s11  ;;  %v1394_v25 = vld [vmem:[#allocation2 + $0x1a0] sm:$0xff] }
 0x2a1   : > { %1541 = vst.msk [vmem:[#allocation3 + $0x88] sm:$0xff] %vm1523_vm8, %v1462_v22  ;;  %v1780_v22 = vld [vmem:[#allocation2 + $0x1a2] sm:$0xff] }
 0x2a2   : > { %v1438_v8 = vpop.permute.xlu2 %1437  ;;  %v1952_v13 = vld [vmem:[#allocation3 + $0x50] sm:$0xff] }
 0x2a3   : > { %1529 = vst.msk [vmem:[#allocation3 + $0x28] sm:$0xff] %vm1523_vm8, %v1438_v8  ;;  %2516 = vmatmul.msk.f32.gmra.mxu1 %vm1979_vm11, %v1952_v13  ;;  %v1779_v8 = vld [vmem:[#allocation2 + $0x19a] sm:$0xff] }
 0x2a5   : > { %1469 = vrot.lane.b32.xlu1 %v1384_v39, %s2751_s13 }
 0x2a6   : > { %1841 = vrot.lane.b32.xlu0 %v1763_v5, %s2750_s12 }
 0x2a7   : > { %v1822_v9 = vpop.permute.xlu1 %1821 }
 0x2a8   : > { %1914 = vst.msk [vmem:[#allocation3 + $0x20] sm:$0xff] %vm1909_vm10, %v1822_v9  ;;  %v1655_v18 = vpop.permute.xlu0 %1654  ;;  %1455 = vrot.lane.b32.xlu2 %v1377_v36, %s2751_s13 }
 0x2a9   : > { %1734 = vst.msk [vmem:[#allocation3 + $0x88] sm:$0xff] %vm1716_vm9, %v1655_v18 }
 0x2aa   : > { %v1643_v42 = vpop.permute.xlu2 %1642 }
 0x2ad   : > { %1662 = vrot.lane.b32.xlu1 %v1577_v7, %s2749_s11  ;;  %v1587_v7 = vld [vmem:[#allocation2 + $0x1a1] sm:$0xff] }
 0x2ae   : > { %1855 = vrot.lane.b32.xlu0 %v1770_v45, %s2750_s12 }
 0x2af   : > { %v1848_v3 = vpop.permute.xlu1 %1847  ;;  %v1946_v11 = vld [vmem:[#allocation3 + $0x20] sm:$0xff] }
 0x2b0   : > { %1927 = vst.msk [vmem:[#allocation3 + $0x88] sm:$0xff] %vm1909_vm10, %v1848_v3  ;;  %2510 = vmatmul.msk.f32.gmra.mxu0 %vm1979_vm11, %v1946_v11  ;;  %v1450_v0 = vpop.permute.xlu0 %1449  ;;  %1481 = vrot.lane.b32.xlu2 %v1390_v10, %s2751_s13 }
 0x2b1   : > { %1535 = vst.msk [vmem:[#allocation3 + $0x58] sm:$0xff] %vm1523_vm8, %v1450_v0 }
 0x2b2   : > { %1728 = vst.msk [vmem:[#allocation3 + $0x58] sm:$0xff] %vm1716_vm9, %v1643_v42  ;;  %v1824_v47 = vpop.permute.xlu2 %1823 }
 0x2b5   : > { %1867 = vrot.lane.b32.xlu1 %v1776_v15, %s2750_s12 }
 0x2b6   : > { %1650 = vrot.lane.b32.xlu0 %v1571_v28, %s2749_s11 }
 0x2b7   : > { %v1631_v17 = vpop.permute.xlu1 %1630  ;;  %v1959_v34 = vld [vmem:[#allocation3 + $0x88] sm:$0xff] }
 0x2b8   : > { %1722 = vst.msk [vmem:[#allocation3 + $0x28] sm:$0xff] %vm1716_vm9, %v1631_v17  ;;  %2523 = vmatmul.msk.f32.gmra.mxu2 %vm1979_vm11, %v1959_v34  ;;  %v1464_v20 = vpop.permute.xlu0 %1463  ;;  %1674 = vrot.lane.b32.xlu2 %v1583_v33, %s2749_s11 }
 0x2b9   : > { %1915 = vst.msk [vmem:[#allocation3 + $0x28] sm:$0xff] %vm1909_vm10, %v1824_v47 }
 0x2ba   : > { %1542 = vst.msk [vmem:[#allocation3 + $0x90] sm:$0xff] %vm1523_vm8, %v1464_v20  ;;  %v1669_v26 = vpop.permute.xlu2 %1668 }
 0x2bd   : > { %1471 = vrot.lane.b32.xlu1 %v1385_v41, %s2751_s13 }
 0x2be   : > { %1843 = vrot.lane.b32.xlu0 %v1764_v40, %s2750_s12 }
 0x2bf   : > { %v1476_v32 = vpop.permute.xlu1 %1475 }
 0x2c0   : > { %1548 = vst.msk [vmem:[#allocation3 + $0xc0] sm:$0xff] %vm1523_vm8, %v1476_v32  ;;  %v1836_v46 = vpop.permute.xlu0 %1835  ;;  %v1947_v31 = vld [vmem:[#allocation3 + $0x28] sm:$0xff]  ;;  %1457 = vrot.lane.b32.xlu2 %v1378_v24, %s2751_s13 }
 0x2c1   : > { %1741 = vst.msk [vmem:[#allocation3 + $0xc0] sm:$0xff] %vm1716_vm9, %v1669_v26  ;;  %2511 = vmatmul.msk.f32.gmra.mxu0 %vm1979_vm11, %v1947_v31 }
 0x2c2   : > { %1921 = vst.msk [vmem:[#allocation3 + $0x58] sm:$0xff] %vm1909_vm10, %v1836_v46  ;;  %v1440_v50 = vpop.permute.xlu2 %1439 }
 0x2c3   : > { %1530 = vst.msk [vmem:[#allocation3 + $0x30] sm:$0xff] %vm1523_vm8, %v1440_v50 }
 0x2c5   : > { %1664 = vrot.lane.b32.xlu1 %v1578_v38, %s2749_s11 }
 0x2c6   : > { %1857 = vrot.lane.b32.xlu0 %v1771_v37, %s2750_s12 }
 0x2c7   : > { %v1657_v54 = vpop.permute.xlu1 %1656 }
 0x2c8   : > { %1735 = vst.msk [vmem:[#allocation3 + $0x90] sm:$0xff] %vm1716_vm9, %v1657_v54  ;;  %v1850_v43 = vpop.permute.xlu0 %1849  ;;  %1483 = vrot.lane.b32.xlu2 %v1391_v44, %s2751_s13 }
 0x2c9   : > { %1928 = vst.msk [vmem:[#allocation3 + $0x90] sm:$0xff] %vm1909_vm10, %v1850_v43  ;;  %v1953_v49 = vld [vmem:[#allocation3 + $0x58] sm:$0xff] }
 0x2ca   : > { %2517 = vmatmul.msk.f32.gmra.mxu1 %vm1979_vm11, %v1953_v49  ;;  %v1645_v48 = vpop.permute.xlu2 %1644 }
 0x2cd   : > { %1869 = vrot.lane.b32.xlu1 %v1777_v57, %s2750_s12 }
 0x2ce   : > { %1485 = vrot.lane.b32.xlu0 %v1392_v53, %s2751_s13 }
 0x2cf   : > { %v1862_v60 = vpop.permute.xlu1 %1861 }
 0x2d0   : > { %1934 = vst.msk [vmem:[#allocation3 + $0xc0] sm:$0xff] %vm1909_vm10, %v1862_v60  ;;  %v1452_v52 = vpop.permute.xlu0 %1451  ;;  %v1960_v12 = vld [vmem:[#allocation3 + $0x90] sm:$0xff]  ;;  %1676 = vrot.lane.b32.xlu2 %v1584_v63, %s2749_s11 }
 0x2d1   : > { %1536 = vst.msk [vmem:[#allocation3 + $0x60] sm:$0xff] %vm1523_vm8, %v1452_v52  ;;  %2524 = vmatmul.msk.f32.gmra.mxu2 %vm1979_vm11, %v1960_v12 }
 0x2d2   : > { %1729 = vst.msk [vmem:[#allocation3 + $0x60] sm:$0xff] %vm1716_vm9, %v1645_v48  ;;  %v1826_v2 = vpop.permute.xlu2 %1825 }
 0x2d5   : > { %1666 = vrot.lane.b32.xlu1 %v1579_v56, %s2749_s11 }
 0x2d6   : > { %1859 = vrot.lane.b32.xlu0 %v1772_v27, %s2750_s12 }
 0x2d7   : > { %v1633_v55 = vpop.permute.xlu1 %1632  ;;  %v1966_v16 = vld [vmem:[#allocation3 + $0xc0] sm:$0xff] }
 0x2d8   : > { %1723 = vst.msk [vmem:[#allocation3 + $0x30] sm:$0xff] %vm1716_vm9, %v1633_v55  ;;  %2530 = vmatmul.msk.f32.vlgmr.msra.gmra.mxu3 %vm1979_vm11, %v1966_v16  ;;  %v1466_v59 = vpop.permute.xlu0 %1465  ;;  %1473 = vrot.lane.b32.xlu2 %v1386_v19, %s2751_s13 }
 0x2d9   : > { %1916 = vst.msk [vmem:[#allocation3 + $0x30] sm:$0xff] %vm1909_vm10, %v1826_v2 }
 0x2da   : > { %1543 = vst.msk [vmem:[#allocation3 + $0x98] sm:$0xff] %vm1523_vm8, %v1466_v59  ;;  %v1671_v21 = vpop.permute.xlu2 %1670 }
 0x2dd   : > { %1871 = vrot.lane.b32.xlu1 %v1778_v29, %s2750_s12 }
 0x2de   : > { %1487 = vrot.lane.b32.xlu0 %v1393_v14, %s2751_s13 }
 0x2df   : > { %v1478_v23 = vpop.permute.xlu1 %1477 }
 0x2e0   : > { %1549 = vst.msk [vmem:[#allocation3 + $0xc8] sm:$0xff] %vm1523_vm8, %v1478_v23  ;;  %v1838_v58 = vpop.permute.xlu0 %1837  ;;  %v1948_v51 = vld [vmem:[#allocation3 + $0x30] sm:$0xff]  ;;  %1678 = vrot.lane.b32.xlu2 %v1585_v35, %s2749_s11 }
 0x2e1   : > { %1742 = vst.msk [vmem:[#allocation3 + $0xc8] sm:$0xff] %vm1716_vm9, %v1671_v21  ;;  %2512 = vmatmul.msk.f32.gmra.mxu0 %vm1979_vm11, %v1948_v51 }
 0x2e2   : > { %1922 = vst.msk [vmem:[#allocation3 + $0x60] sm:$0xff] %vm1909_vm10, %v1838_v58  ;;  %v1442_v62 = vpop.permute.xlu2 %1441 }
 0x2e3   : > { %1531 = vst.msk [vmem:[#allocation3 + $0x38] sm:$0xff] %vm1523_vm8, %v1442_v62 }
 0x2e5   : > { %1680 = vrot.lane.b32.xlu1 %v1586_v30, %s2749_s11 }
 0x2e6   : > { %1295 = vrot.lane.b32.xlu0 %v1778_v29, %s2748_s10 }
 0x2e7   : > { %v1659_v4 = vpop.permute.xlu1 %1658 }
 0x2e8   : > { %1736 = vst.msk [vmem:[#allocation3 + $0x98] sm:$0xff] %vm1716_vm9, %v1659_v4  ;;  %v1852_v6 = vpop.permute.xlu0 %1851  ;;  %1293 = vrot.lane.b32.xlu2 %v1777_v57, %s2748_s10  ;;  %s2544_s10 = sshll.u32 %s2799_s19, 8 }
 0x2e9   : > { %1929 = vst.msk [vmem:[#allocation3 + $0x98] sm:$0xff] %vm1909_vm10, %v1852_v6  ;;  %v1954_v61 = vld [vmem:[#allocation3 + $0x60] sm:$0xff] }
 0x2ea   : > { %2518 = vmatmul.msk.f32.gmra.mxu1 %vm1979_vm11, %v1954_v61  ;;  %v1647_v1 = vpop.permute.xlu2 %1646 }
 0x2ed   : > { %1489 = vrot.lane.b32.xlu1 %v1394_v25, %s2751_s13  ;;  %v2097_v39 = vpop.f32.mrf.mxu0  ;;  %s2353_s13 = scalar_lea.hbm %s4142_s2, %s2544_s10 }
 0x2ee   : > { %2193 = vst [vmem:[%s3904_s22] sm:$0xff] %v2097_v39  ;;  %1875 = vrot.lane.b32.xlu0 %v1780_v22, %s2750_s12  ;;  %v2263_v42 = vmul.f32 %v2097_v39, %v2097_v39  ;;  %s2356_s27 = sshll.u32 %s2353_s13, 4  ;;  %s2357_s27 = int_to_ptr.hbm [resolvable:$true] %s2356_s27 }
 0x2ef   : > { %v1864_v13 = vpop.permute.xlu1 %1863  ;;  %s2633_s29 = sshra.s32 %s2357_s27, 4  ;;  %s2634_s29 = int_to_ptr.hbm [resolvable:$true] %s2633_s29 }
 0x2f0   : > { %1935 = vst.msk [vmem:[#allocation3 + $0xc8] sm:$0xff] %vm1909_vm10, %v1864_v13  ;;  %v1454_v5 = vpop.permute.xlu0 %1453  ;;  %v1961_v36 = vld [vmem:[#allocation3 + $0x98] sm:$0xff]  ;;  %1873 = vrot.lane.b32.xlu2 %v1779_v8, %s2750_s12  ;;  %s2635_s30 = scalar_lea.hbm %s2634_s29, 256  ;;  %p2640_p0 = scmp.lt.s32.totalorder %s2634_s29, %s4142_s2 }
 0x2f1   : > { %1537 = vst.msk [vmem:[#allocation3 + $0x68] sm:$0xff] %vm1523_vm8, %v1454_v5  ;;  %2525 = vmatmul.msk.f32.gmra.mxu2 %vm1979_vm11, %v1961_v36  ;;  %p2636_p11 = scmp.ne.s32.totalorder %s2634_s29, %s2635_s30  ;;  %p2641_p1 = scmp.lt.s32.totalorder %s2639_s8, %s2635_s30 }
 0x2f2   : > { %1730 = vst.msk [vmem:[#allocation3 + $0x68] sm:$0xff] %vm1716_vm9, %v1647_v1  ;;  %v1828_v9 = vpop.permute.xlu2 %1827 }
 0x2f3   : > { %p2637_p12 = pnand %p2636_p11, %p2818_p5  ;;  %p2642_p2 = por %p2641_p1, %p2640_p0 }
 0x2f5   : > { %v2100_v18 = vpop.f32.mrf.mxu0  ;;  %p2638_p13 = pneg %p2637_p12 }
 0x2f6   : > { %2194 = vst [vmem:[%s3904_s22 + $0x8] sm:$0xff] %v2100_v18  ;;  %v2225_v45 = vadd.f32 %v2100_v18, %v2097_v39  ;;  %v2264_v10 = vmul.f32 %v2100_v18, %v2100_v18 }
 0x2f7   : > { %v1635_v3 = vpop.permute.xlu1 %1634  ;;  %v1967_v11 = vld [vmem:[#allocation3 + $0xc8] sm:$0xff]  ;;  %p2643_p3 = pnand %p2642_p2, %p2638_p13 }
 0x2f8   : > { %v2295_v0 = vadd.f32 %v2264_v10, %v2263_v42  ;;  %1724 = vst.msk [vmem:[#allocation3 + $0x38] sm:$0xff] %vm1716_vm9, %v1635_v3  ;;  %2531 = vmatmul.msk.f32.gmra.mxu3 %vm1979_vm11, %v1967_v11  ;;  %v1468_v15 = vpop.permute.xlu0 %1467  ;;  %1682 = vrot.lane.b32.xlu2 %v1587_v7, %s2749_s11 }
 0x2f9   : > { %1917 = vst.msk [vmem:[#allocation3 + $0x38] sm:$0xff] %vm1909_vm10, %v1828_v9 }
 0x2fa   : > { %1544 = vst.msk [vmem:[#allocation3 + $0xa0] sm:$0xff] %vm1523_vm8, %v1468_v15  ;;  %v1673_v47 = vpop.permute.xlu2 %1672 }
 0x2fe   : > { %v2103_v28 = vpop.f32.mrf.mxu0 }
 0x2ff   : > { %v1480_v33 = vpop.permute.xlu1 %1479  ;;  %2195 = vst [vmem:[%s3904_s22 + $0x10] sm:$0xff] %v2103_v28  ;;  %v2226_v17 = vadd.f32 %v2225_v45, %v2103_v28  ;;  %v2265_v34 = vmul.f32 %v2103_v28, %v2103_v28 }
 0x300   : > { %1550 = vst.msk [vmem:[#allocation3 + $0xd0] sm:$0xff] %vm1523_vm8, %v1480_v33  ;;  %v1840_v20 = vpop.permute.xlu0 %1839  ;;  %v1949_v41 = vld [vmem:[#allocation3 + $0x38] sm:$0xff] }
 0x301   : > { %v2296_v26 = vadd.f32 %v2295_v0, %v2265_v34  ;;  %1923 = vst.msk [vmem:[#allocation3 + $0x68] sm:$0xff] %vm1909_vm10, %v1840_v20  ;;  %2513 = vmatmul.msk.f32.gmra.mxu0 %vm1979_vm11, %v1949_v41 }
 0x302   : > { %1743 = vst.msk [vmem:[#allocation3 + $0xd0] sm:$0xff] %vm1716_vm9, %v1673_v47  ;;  %v1456_v40 = vpop.permute.xlu2 %1455 }
 0x303   : > { %1538 = vst.msk [vmem:[#allocation3 + $0x70] sm:$0xff] %vm1523_vm8, %v1456_v40 }
 0x305   : > { %v3925_v24 = vpop.f32.mrf.mxu1 }
 0x306   : > { %2201 = vst [vmem:[%s3904_s22 + $0x40] sm:$0xff] %v3925_v24 }
 0x307   : > { %v1661_v32 = vpop.permute.xlu1 %1660 }
 0x308   : > { %1737 = vst.msk [vmem:[#allocation3 + $0xa0] sm:$0xff] %vm1716_vm9, %v1661_v32  ;;  %v1854_v46 = vpop.permute.xlu0 %1853  ;;  %v1955_v31 = vld [vmem:[#allocation3 + $0x68] sm:$0xff] }
 0x309   : > { %1930 = vst.msk [vmem:[#allocation3 + $0xa0] sm:$0xff] %vm1909_vm10, %v1854_v46  ;;  %2519 = vmatmul.msk.f32.gmra.mxu1 %vm1979_vm11, %v1955_v31 }
 0x30a   : > { %v1482_v38 = vpop.permute.xlu2 %1481 }
 0x30b   : > { %1551 = vst.msk [vmem:[#allocation3 + $0xd8] sm:$0xff] %vm1523_vm8, %v1482_v38 }
 0x30d   : > { %v3933_v50 = vpop.f32.mrf.mxu1 }
 0x30e   : > { %2202 = vst [vmem:[%s3904_s22 + $0x48] sm:$0xff] %v3933_v50 }
 0x30f   : > { %v1866_v37 = vpop.permute.xlu1 %1865 }
 0x310   : > { %1936 = vst.msk [vmem:[#allocation3 + $0xd0] sm:$0xff] %vm1909_vm10, %v1866_v37  ;;  %v1649_v44 = vpop.permute.xlu0 %1648  ;;  %v1962_v54 = vld [vmem:[#allocation3 + $0xa0] sm:$0xff] }
 0x311   : > { %1731 = vst.msk [vmem:[#allocation3 + $0x70] sm:$0xff] %vm1716_vm9, %v1649_v44  ;;  %2526 = vmatmul.msk.f32.gmra.mxu2 %vm1979_vm11, %v1962_v54 }
 0x312   : > { %v1675_v43 = vpop.permute.xlu2 %1674 }
 0x313   : > { %1744 = vst.msk [vmem:[#allocation3 + $0xd8] sm:$0xff] %vm1716_vm9, %v1675_v43 }
 0x315   : > { %v2106_v49 = vpop.f32.mrf.mxu0 }
 0x316   : > { %2196 = vst [vmem:[%s3904_s22 + $0x18] sm:$0xff] %v2106_v49  ;;  %v2227_v57 = vadd.f32 %v2226_v17, %v2106_v49  ;;  %v2266_v48 = vmul.f32 %v2106_v49, %v2106_v49 }
 0x317   : > { %v1470_v53 = vpop.permute.xlu1 %1469  ;;  %v1968_v63 = vld [vmem:[#allocation3 + $0xd0] sm:$0xff] }
 0x318   : > { %v2297_v60 = vadd.f32 %v2296_v26, %v2266_v48  ;;  %1545 = vst.msk [vmem:[#allocation3 + $0xa8] sm:$0xff] %vm1523_vm8, %v1470_v53  ;;  %2532 = vmatmul.msk.f32.gmra.mxu3 %vm1979_vm11, %v1968_v63  ;;  %v1842_v52 = vpop.permute.xlu0 %1841 }
 0x319   : > { %1924 = vst.msk [vmem:[#allocation3 + $0x70] sm:$0xff] %vm1909_vm10, %v1842_v52 }
 0x31a   : > { %v1458_v12 = vpop.permute.xlu2 %1457 }
 0x31b   : > { %1539 = vst.msk [vmem:[#allocation3 + $0x78] sm:$0xff] %vm1523_vm8, %v1458_v12 }
 0x31f   : > { %v1663_v56 = vpop.permute.xlu1 %1662 }
 0x320   : > { %1738 = vst.msk [vmem:[#allocation3 + $0xa8] sm:$0xff] %vm1716_vm9, %v1663_v56  ;;  %v1856_v2 = vpop.permute.xlu0 %1855  ;;  %v1956_v27 = vld [vmem:[#allocation3 + $0x70] sm:$0xff]  ;;  %v3947_v19 = vpop.f32.mrf.mxu1  ;;  %v2272_v56 = vmul.f32 %v3933_v50, %v3933_v50 }
 0x321   : > { %1931 = vst.msk [vmem:[#allocation3 + $0xa8] sm:$0xff] %vm1909_vm10, %v1856_v2  ;;  %2520 = vmatmul.msk.f32.gmra.mxu1 %vm1979_vm11, %v1956_v27 }
 0x322   : > { %2203 = vst [vmem:[%s3904_s22 + $0x50] sm:$0xff] %v3947_v19  ;;  %v1484_v55 = vpop.permute.xlu2 %1483 }
 0x323   : > { %v3953_v16 = vpop.f32.mrf.mxu2  ;;  %1552 = vst.msk [vmem:[#allocation3 + $0xe0] sm:$0xff] %vm1523_vm8, %v1484_v55  ;;  %v2273_v55 = vmul.f32 %v3947_v19, %v3947_v19 }
 0x324   : > { %2209 = vst [vmem:[%s3904_s22 + $0x80] sm:$0xff] %v3953_v16 }
 0x327   : > { %v1868_v59 = vpop.permute.xlu1 %1867 }
 0x328   : > { %1937 = vst.msk [vmem:[#allocation3 + $0xd8] sm:$0xff] %vm1909_vm10, %v1868_v59  ;;  %v1651_v29 = vpop.permute.xlu0 %1650  ;;  %v1963_v21 = vld [vmem:[#allocation3 + $0xa8] sm:$0xff] }
 0x329   : > { %1732 = vst.msk [vmem:[#allocation3 + $0x78] sm:$0xff] %vm1716_vm9, %v1651_v29  ;;  %2527 = vmatmul.msk.f32.gmra.mxu2 %vm1979_vm11, %v1963_v21 }
 0x32a   : > { %v1677_v14 = vpop.permute.xlu2 %1676 }
 0x32b   : > { %1745 = vst.msk [vmem:[#allocation3 + $0xe0] sm:$0xff] %vm1716_vm9, %v1677_v14 }
 0x32d   : > { %v2109_v35 = vpop.f32.mrf.mxu0 }
 0x32e   : > { %2197 = vst [vmem:[%s3904_s22 + $0x20] sm:$0xff] %v2109_v35  ;;  %v2228_v23 = vadd.f32 %v2227_v57, %v2109_v35  ;;  %v2267_v58 = vmul.f32 %v2109_v35, %v2109_v35 }
 0x32f   : > { %v1472_v51 = vpop.permute.xlu1 %1471  ;;  %v1969_v30 = vld [vmem:[#allocation3 + $0xd8] sm:$0xff] }
 0x330   : > { %v2298_v62 = vadd.f32 %v2297_v60, %v2267_v58  ;;  %1546 = vst.msk [vmem:[#allocation3 + $0xb0] sm:$0xff] %vm1523_vm8, %v1472_v51  ;;  %2533 = vmatmul.msk.f32.gmra.mxu3 %vm1979_vm11, %v1969_v30  ;;  %v1844_v4 = vpop.permute.xlu0 %1843  ;;  %v2271_v60 = vmul.f32 %v3925_v24, %v3925_v24 }
 0x331   : > { %1925 = vst.msk [vmem:[#allocation3 + $0x78] sm:$0xff] %vm1909_vm10, %v1844_v4 }
 0x332   : > { %v1474_v6 = vpop.permute.xlu2 %1473 }
 0x333   : > { %1547 = vst.msk [vmem:[#allocation3 + $0xb8] sm:$0xff] %vm1523_vm8, %v1474_v6 }
 0x337   : > { %v1665_v61 = vpop.permute.xlu1 %1664 }
 0x338   : > { %1739 = vst.msk [vmem:[#allocation3 + $0xb0] sm:$0xff] %vm1716_vm9, %v1665_v61  ;;  %v1858_v25 = vpop.permute.xlu0 %1857  ;;  %v1957_v1 = vld [vmem:[#allocation3 + $0x78] sm:$0xff] }
 0x339   : > { %1932 = vst.msk [vmem:[#allocation3 + $0xb0] sm:$0xff] %vm1909_vm10, %v1858_v25  ;;  %2521 = vmatmul.msk.f32.gmra.mxu1 %vm1979_vm11, %v1957_v1 }
 0x33a   : > { %v1679_v22 = vpop.permute.xlu2 %1678 }
 0x33b   : > { %v3970_v39 = vpop.f32.mrf.mxu2 }
 0x33c   : > { %2210 = vst [vmem:[%s3904_s22 + $0x88] sm:$0xff] %v3970_v39 }
 0x33e   : > { %v2112_v8 = vpop.f32.mrf.mxu0 }
 0x33f   : > { %2198 = vst [vmem:[%s3904_s22 + $0x28] sm:$0xff] %v2112_v8  ;;  %v2229_v13 = vadd.f32 %v2228_v23, %v2112_v8  ;;  %v2268_v5 = vmul.f32 %v2112_v8, %v2112_v8  ;;  %v1870_v36 = vpop.permute.xlu1 %1869 }
 0x340   : > { %1938 = vst.msk [vmem:[#allocation3 + $0xe0] sm:$0xff] %vm1909_vm10, %v1870_v36  ;;  %v1486_v9 = vpop.permute.xlu0 %1485  ;;  %v1964_v18 = vld [vmem:[#allocation3 + $0xb0] sm:$0xff] }
 0x341   : > { %v2299_v7 = vadd.f32 %v2298_v62, %v2268_v5  ;;  %1553 = vst.msk [vmem:[#allocation3 + $0xe8] sm:$0xff] %vm1523_vm8, %v1486_v9  ;;  %2528 = vmatmul.msk.f32.gmra.mxu2 %vm1979_vm11, %v1964_v18  ;;  %v2279_v18 = vmul.f32 %v3953_v16, %v3953_v16 }
 0x342   : > { %1746 = vst.msk [vmem:[#allocation3 + $0xe8] sm:$0xff] %vm1716_vm9, %v1679_v22  ;;  %v1294_v42 = vpop.permute.xlu2 %1293 }
 0x343   : > { %1360 = vst.msk [vmem:[#allocation3 + $0xf0] sm:$0xff] %vm1329_vm6, %v1294_v42 }
 0x347   : > { %v3980_v45 = vpop.f32.mrf.mxu1  ;;  %v1667_v10 = vpop.permute.xlu1 %1666  ;;  %v1970_v3 = vld [vmem:[#allocation3 + $0xe0] sm:$0xff] }
 0x348   : > { %2204 = vst [vmem:[%s3904_s22 + $0x58] sm:$0xff] %v3980_v45  ;;  %2534 = vmatmul.msk.f32.gmra.mxu3 %vm1979_vm11, %v1970_v3  ;;  %v1860_v11 = vpop.permute.xlu0 %1859  ;;  %v2274_v14 = vmul.f32 %v3980_v45, %v3980_v45 }
 0x349   : > { %1740 = vst.msk [vmem:[#allocation3 + $0xb8] sm:$0xff] %vm1716_vm9, %v1667_v10 }
 0x34a   : > { %1933 = vst.msk [vmem:[#allocation3 + $0xb8] sm:$0xff] %vm1909_vm10, %v1860_v11  ;;  %v1874_v33 = vpop.permute.xlu2 %1873 }
 0x34f   : > { %v1872_v0 = vpop.permute.xlu1 %1871 }
 0x350   : > { %1939 = vst.msk [vmem:[#allocation3 + $0xe8] sm:$0xff] %vm1909_vm10, %v1872_v0  ;;  %v1488_v15 = vpop.permute.xlu0 %1487 }
 0x351   : > { %1554 = vst.msk [vmem:[#allocation3 + $0xf0] sm:$0xff] %vm1523_vm8, %v1488_v15  ;;  %v1965_v47 = vld [vmem:[#allocation3 + $0xb8] sm:$0xff] }
 0x352   : > { %2529 = vmatmul.msk.f32.gmra.mxu2 %vm1979_vm11, %v1965_v47  ;;  %v1683_v40 = vpop.permute.xlu2 %1682 }
 0x354   : > { %v3990_v28 = vpop.f32.mrf.mxu2 }
 0x355   : > { %2211 = vst [vmem:[%s3904_s22 + $0x90] sm:$0xff] %v3990_v28  ;;  %v2281_v11 = vmul.f32 %v3990_v28, %v3990_v28 }
 0x357   : > { %v1681_v17 = vpop.permute.xlu1 %1680  ;;  %v1971_v34 = vld [vmem:[#allocation3 + $0xe8] sm:$0xff] }
 0x358   : > { %1747 = vst.msk [vmem:[#allocation3 + $0xf0] sm:$0xff] %vm1716_vm9, %v1681_v17  ;;  %2535 = vmatmul.msk.f32.gmra.mxu3 %vm1979_vm11, %v1971_v34  ;;  %v1296_v20 = vpop.permute.xlu0 %1295 }
 0x359   : > { %1940 = vst.msk [vmem:[#allocation3 + $0xf0] sm:$0xff] %vm1909_vm10, %v1874_v33 }
 0x35a   : > { %1361 = vst.msk [vmem:[#allocation3 + $0xf8] sm:$0xff] %vm1329_vm6, %v1296_v20 }
 0x35b   : > { %v3998_v41 = vpop.f32.mrf.mxu3 }
 0x35c   : > { %2217 = vst [vmem:[%s3904_s22 + $0xc0] sm:$0xff] %v3998_v41 }
 0x35e   : > { %v2115_v26 = vpop.f32.mrf.mxu0 }
 0x35f   : > { %2199 = vst [vmem:[%s3904_s22 + $0x30] sm:$0xff] %v2115_v26  ;;  %v2230_v32 = vadd.f32 %v2229_v13, %v2115_v26  ;;  %v2269_v46 = vmul.f32 %v2115_v26, %v2115_v26  ;;  %v1490_v31 = vpop.permute.xlu1 %1489 }
 0x360   : > { %1555 = vst.msk [vmem:[#allocation3 + $0xf8] sm:$0xff] %vm1523_vm8, %v1490_v31  ;;  %v1876_v38 = vpop.permute.xlu0 %1875  ;;  %v1972_v37 = vld [vmem:[#allocation3 + $0xf0] sm:$0xff] }
 0x361   : > { %v2300_v44 = vadd.f32 %v2299_v7, %v2269_v46  ;;  %1748 = vst.msk [vmem:[#allocation3 + $0xf8] sm:$0xff] %vm1716_vm9, %v1683_v40  ;;  %2536 = vmatmul.msk.f32.gmra.mxu3 %vm1979_vm11, %v1972_v37 }
 0x362   : > { %1941 = vst.msk [vmem:[#allocation3 + $0xf8] sm:$0xff] %vm1909_vm10, %v1876_v38 }
 0x367   : > { %v2133_v54 = vpop.f32.mrf.mxu1 }
 0x368   : > { %2205 = vst [vmem:[%s3904_s22 + $0x60] sm:$0xff] %v2133_v54 }
 0x369   : > { %v1973_v43 = vld [vmem:[#allocation3 + $0xf8] sm:$0xff] }
 0x36a   : > { %2537 = vmatmul.msk.f32.gmra.mxu3 %vm1979_vm11, %v1973_v43 }
 0x374   : > { %v2154_v49 = vpop.f32.mrf.mxu2 }
 0x375   : > { %2212 = vst [vmem:[%s3904_s22 + $0x98] sm:$0xff] %v2154_v49  ;;  %v2282_v47 = vmul.f32 %v2154_v49, %v2154_v49 }
 0x37b   : > { %v4010_v57 = vpop.f32.mrf.mxu3 }
 0x37c   : > { %2218 = vst [vmem:[%s3904_s22 + $0xc8] sm:$0xff] %v4010_v57 }
 0x37e   : > { %v2118_v48 = vpop.f32.mrf.mxu0 }
 0x37f   : > { %2200 = vst [vmem:[%s3904_s22 + $0x38] sm:$0xff] %v2118_v48  ;;  %v2231_v53 = vadd.f32 %v2230_v32, %v2118_v48  ;;  %v2270_v63 = vmul.f32 %v2118_v48, %v2118_v48 }
 0x381   : > { %v2232_v52 = vadd.f32 %v2231_v53, %v3925_v24  ;;  %v2301_v12 = vadd.f32 %v2300_v44, %v2270_v63  ;;  %v2288_v63 = vmul.f32 %v4010_v57, %v4010_v57 }
 0x383   : > { %v2233_v2 = vadd.f32 %v2232_v52, %v3933_v50  ;;  %v2302_v27 = vadd.f32 %v2301_v12, %v2271_v60  ;;  %v2275_v50 = vmul.f32 %v2133_v54, %v2133_v54 }
 0x385   : > { %v2234_v59 = vadd.f32 %v2233_v2, %v3947_v19  ;;  %v2303_v29 = vadd.f32 %v2302_v27, %v2272_v56 }
 0x386   : > { %v2136_v21 = vpop.f32.mrf.mxu1 }
 0x387   : > { %v2304_v24 = vadd.f32 %v2303_v29, %v2273_v55  ;;  %2206 = vst [vmem:[%s3904_s22 + $0x68] sm:$0xff] %v2136_v21  ;;  %v2235_v35 = vadd.f32 %v2234_v59, %v3980_v45  ;;  %v2276_v30 = vmul.f32 %v2136_v21, %v2136_v21  ;;  %v2280_v45 = vmul.f32 %v3970_v39, %v3970_v39 }
 0x389   : > { %v2236_v23 = vadd.f32 %v2235_v35, %v2133_v54  ;;  %v2305_v58 = vadd.f32 %v2304_v24, %v2274_v14 }
 0x38b   : > { %v2237_v51 = vadd.f32 %v2236_v23, %v2136_v21  ;;  %v2306_v62 = vadd.f32 %v2305_v58, %v2275_v50 }
 0x38d   : > { %v2307_v19 = vadd.f32 %v2306_v62, %v2276_v30 }
 0x394   : > { %v2157_v4 = vpop.f32.mrf.mxu2 }
 0x395   : > { %2213 = vst [vmem:[%s3904_s22 + $0xa0] sm:$0xff] %v2157_v4 }
 0x39b   : > { %v2175_v6 = vpop.f32.mrf.mxu3 }
 0x39c   : > { %2219 = vst [vmem:[%s3904_s22 + $0xd0] sm:$0xff] %v2175_v6  ;;  %v2289_v56 = vmul.f32 %v2175_v6, %v2175_v6 }
 0x39e   : > { %v2139_v61 = vpop.f32.mrf.mxu1 }
 0x39f   : > { %2207 = vst [vmem:[%s3904_s22 + $0x70] sm:$0xff] %v2139_v61  ;;  %v2277_v1 = vmul.f32 %v2139_v61, %v2139_v61  ;;  %v2238_v8 = vadd.f32 %v2237_v51, %v2139_v61 }
 0x3a1   : > { %v2308_v5 = vadd.f32 %v2307_v19, %v2277_v1 }
 0x3ac   : > { %v2160_v25 = vpop.f32.mrf.mxu2 }
 0x3ad   : > { %2214 = vst [vmem:[%s3904_s22 + $0xa8] sm:$0xff] %v2160_v25 }
 0x3b3   : > { %v2178_v22 = vpop.f32.mrf.mxu3 }
 0x3b4   : > { %2220 = vst [vmem:[%s3904_s22 + $0xd8] sm:$0xff] %v2178_v22  ;;  %v2290_v59 = vmul.f32 %v2178_v22, %v2178_v22 }
 0x3b6   : > { %v2142_v13 = vpop.f32.mrf.mxu1 }
 0x3b7   : > { %2208 = vst [vmem:[%s3904_s22 + $0x78] sm:$0xff] %v2142_v13  ;;  %v2239_v36 = vadd.f32 %v2238_v8, %v2142_v13  ;;  %v2278_v9 = vmul.f32 %v2142_v13, %v2142_v13 }
 0x3b9   : > { %v2240_v7 = vadd.f32 %v2239_v36, %v3953_v16  ;;  %v2309_v42 = vadd.f32 %v2308_v5, %v2278_v9  ;;  %v2283_v16 = vmul.f32 %v2157_v4, %v2157_v4 }
 0x3bb   : > { %v2241_v10 = vadd.f32 %v2240_v7, %v3970_v39  ;;  %v2310_v3 = vadd.f32 %v2309_v42, %v2279_v18  ;;  %v2284_v39 = vmul.f32 %v2160_v25, %v2160_v25 }
 0x3bd   : > { %v2242_v0 = vadd.f32 %v2241_v10, %v3990_v28  ;;  %v2311_v15 = vadd.f32 %v2310_v3, %v2280_v45 }
 0x3bf   : > { %v2312_v33 = vadd.f32 %v2311_v15, %v2281_v11  ;;  %v2243_v17 = vadd.f32 %v2242_v0, %v2154_v49  ;;  %v2287_v49 = vmul.f32 %v3998_v41, %v3998_v41 }
 0x3c1   : > { %v2244_v34 = vadd.f32 %v2243_v17, %v2157_v4  ;;  %v2313_v20 = vadd.f32 %v2312_v33, %v2282_v47 }
 0x3c3   : > { %v2314_v26 = vadd.f32 %v2313_v20, %v2283_v16  ;;  %v2245_v46 = vadd.f32 %v2244_v34, %v2160_v25 }
 0x3c4   : > { %v2163_v40 = vpop.f32.mrf.mxu2 }
 0x3c5   : > { %2215 = vst [vmem:[%s3904_s22 + $0xb0] sm:$0xff] %v2163_v40  ;;  %v2285_v31 = vmul.f32 %v2163_v40, %v2163_v40  ;;  %v2315_v38 = vadd.f32 %v2314_v26, %v2284_v39  ;;  %v2246_v37 = vadd.f32 %v2245_v46, %v2163_v40 }
 0x3c7   : > { %v2316_v44 = vadd.f32 %v2315_v38, %v2285_v31 }
 0x3cb   : > { %v2181_v32 = vpop.f32.mrf.mxu3 }
 0x3cc   : > { %2221 = vst [vmem:[%s3904_s22 + $0xe0] sm:$0xff] %v2181_v32 }
 0x3d5   : > { %v2166_v28 = vpop.f32.mrf.mxu2 }
 0x3d6   : > { %2216 = vst [vmem:[%s3904_s22 + $0xb8] sm:$0xff] %v2166_v28  ;;  %v2247_v54 = vadd.f32 %v2246_v37, %v2166_v28  ;;  %v2286_v43 = vmul.f32 %v2166_v28, %v2166_v28 }
 0x3d8   : > { %v2248_v48 = vadd.f32 %v2247_v54, %v3998_v41  ;;  %v2317_v53 = vadd.f32 %v2316_v44, %v2286_v43  ;;  %v2291_v41 = vmul.f32 %v2181_v32, %v2181_v32 }
 0x3da   : > { %v2249_v60 = vadd.f32 %v2248_v48, %v4010_v57  ;;  %v2318_v52 = vadd.f32 %v2317_v53, %v2287_v49 }
 0x3db   : > { %v2184_v12 = vpop.f32.mrf.mxu3 }
 0x3dc   : > { %v2250_v2 = vadd.f32 %v2249_v60, %v2175_v6  ;;  %v2319_v27 = vadd.f32 %v2318_v52, %v2288_v63  ;;  %2222 = vst [vmem:[%s3904_s22 + $0xe8] sm:$0xff] %v2184_v12  ;;  %v2292_v50 = vmul.f32 %v2184_v12, %v2184_v12 }
 0x3de   : > { %v2320_v55 = vadd.f32 %v2319_v27, %v2289_v56  ;;  %v2251_v29 = vadd.f32 %v2250_v2, %v2178_v22 }
 0x3e0   : > { %v2321_v21 = vadd.f32 %v2320_v55, %v2290_v59  ;;  %v2252_v14 = vadd.f32 %v2251_v29, %v2181_v32 }
 0x3e2   : > { %v2322_v35 = vadd.f32 %v2321_v21, %v2291_v41  ;;  %v2253_v57 = vadd.f32 %v2252_v14, %v2184_v12 }
 0x3e4   : > { %v2187_v24 = vpop.f32.mrf.mxu3  ;;  %v2323_v23 = vadd.f32 %v2322_v35, %v2292_v50 }
 0x3e5   : > { %2223 = vst [vmem:[%s3904_s22 + $0xf0] sm:$0xff] %v2187_v24  ;;  %v2293_v58 = vmul.f32 %v2187_v24, %v2187_v24  ;;  %v2254_v51 = vadd.f32 %v2253_v57, %v2187_v24 }
 0x3e7   : > { %v2324_v62 = vadd.f32 %v2323_v23, %v2293_v58 }
 0x3ed   : > { %v2190_v30 = vpop.f32.mrf.mxu3 }
 0x3ee   : > { %2224 = vst [vmem:[%s3904_s22 + $0xf8] sm:$0xff] %v2190_v30  ;;  %v2255_v19 = vadd.f32 %v2254_v51, %v2190_v30  ;;  %v2294_v4 = vmul.f32 %v2190_v30, %v2190_v30 }
 0x3ef   : > { %2646 = shalt.err (!%p2643_p3)
}
 0x3f0   : > { %s2752_s22 = smov 128   ;;  %v2256_v6 = vrot.slane %v2255_v19, 4  ;;  %v2325_v61 = vadd.f32 %v2324_v62, %v2294_v4  ;;  %s2368_s13 = scalar_lea.hbm %s4143_s3, %s2799_s19 }
 0x3f1   : > { %2560 = dma.vmem_to_hbm [thread:$0]  (%p2818_p5), %s2355_s23, 4096, %s2357_s27, %s2334_s28, %s2752_s22, %s2752_s22, %s2745_s7  }
 0x3f2   : > { %v2257_v25 = vadd.f32 %v2256_v6, %v2255_v19  ;;  %v2326_v1 = vrot.slane %v2325_v61, 4  ;;  %s2338_s29 = sand.u32 1, %s2799_s19   ;;  %s2381_s6 = scalar_lea.hbm %s4144_s4, %s2799_s19 }
 0x3f3   : > { %s200_s8 = scalar_lea.vmem [#allocation6], %s3895_s9  ;;  %s4084_s23 = sshll.u32 %s2368_s13, 4  ;;  %s2373_s23 = int_to_ptr.hbm [resolvable:$true] %s4084_s23 }
 0x3f4   : > { %v2258_v22 = vrot.slane %v2257_v25, 2  ;;  %v2327_v8 = vadd.f32 %v2326_v1, %v2325_v61  ;;  %s4082_s7 = sshll.u32 %s200_s8, 4  ;;  %s206_s27 = scalar_lea.vmem [#allocation8], %s3895_s9  ;;  %s2371_s7 = int_to_ptr.vmem [resolvable:$true] %s4082_s7 }
 0x3f5   : > { %s4087_s28 = sshll.u32 %s206_s27, 4  ;;  %s4089_s14 = sshll.u32 %s2381_s6, 4  ;;  %s2384_s28 = int_to_ptr.vmem [resolvable:$true] %s4087_s28  ;;  %s2386_s14 = int_to_ptr.hbm [resolvable:$true] %s4089_s14 }
 0x3f6   : > { %v2259_v13 = vadd.f32 %v2258_v22, %v2257_v25  ;;  %v2328_v5 = vrot.slane %v2327_v8, 2  ;;  %s2339_s19 = scalar_lea.sflag [#allocation7], %s2338_s29  ;;  %s2661_s10 = sshra.s32 %s2373_s23, 4  ;;  %s2662_s10 = int_to_ptr.hbm [resolvable:$true] %s2661_s10 }
 0x3f7   : > { %s2663_s22 = scalar_lea.hbm %s2662_s10, 1  ;;  %s2667_s12 = scalar_lea.hbm %s4143_s3, 2 }
 0x3f8   : > { %v2329_v36 = vadd.f32 %v2328_v5, %v2327_v8  ;;  %v2260_v9 = vrot.slane %v2259_v13, 1  ;;  %p2664_p4 = scmp.ne.s32.totalorder %s2662_s10, %s2663_s22  ;;  %p2668_p9 = scmp.lt.s32.totalorder %s2662_s10, %s4143_s3 }
 0x3f9   : > { %p2669_p10 = scmp.lt.s32.totalorder %s2667_s12, %s2663_s22 }
 0x3fa   : > { %v2261_v18 = vadd.f32 %v2260_v9, %v2259_v13  ;;  %v2330_v7 = vrot.slane %v2329_v36, 1  ;;  %p2665_p7 = pnand %p2664_p4, %p2818_p5 }
 0x3fb   : > { %p2670_p11 = por %p2669_p10, %p2668_p9 }
 0x3fc   : > { %2262 = vst [vmem:[%s200_s8] sm:$0x1] %v2261_v18  ;;  %v2331_v42 = vadd.f32 %v2330_v7, %v2329_v36  ;;  %p2666_p8 = pneg %p2665_p7 }
 0x3fe   : > { %p2671_p12 = pnand %p2670_p11, %p2666_p8 }
 0x400   : > { %2674 = shalt.err (!%p2671_p12)
}
 0x401   : > { %2561 = dma.vmem_to_hbm [thread:$0]  (%p2818_p5), %s2371_s7, 16, %s2373_s23, %s2339_s19   ;;  %2332 = vst [vmem:[%s206_s27] sm:$0x1] %v2331_v42 }
 0x402   : > { %s2689_s29 = sshra.s32 %s2386_s14, 4  ;;  %s2695_s10 = scalar_lea.hbm %s4144_s4, 2  ;;  %s2690_s29 = int_to_ptr.hbm [resolvable:$true] %s2689_s29 }
 0x403   : > { %s2691_s5 = scalar_lea.hbm %s2690_s29, 1  ;;  %p2696_p2 = scmp.lt.s32.totalorder %s2690_s29, %s4144_s4 }
 0x404   : > { %p2692_p13 = scmp.ne.s32.totalorder %s2690_s29, %s2691_s5  ;;  %p2697_p3 = scmp.lt.s32.totalorder %s2695_s10, %s2691_s5 }
 0x406   : > { %p2693_p0 = pnand %p2692_p13, %p2818_p5  ;;  %p2698_p4 = por %p2697_p3, %p2696_p2 }
 0x408   : > { %p2694_p1 = pneg %p2693_p0 }
 0x40a   : > { %p2699_p7 = pnand %p2698_p4, %p2694_p1 }
 0x40c   : > { %2702 = shalt.err (!%p2699_p7)
}
 0x40d   : > { %2562 = dma.vmem_to_hbm [thread:$0]  (%p2818_p5), %s2384_s28, 16, %s2386_s14, %s2339_s19  }
 0x40e PF: > { %p2576_p8 = scmp.ge.s32.totalorder %s2741_s18, 2  ;;  %s2397_s7 = sand.u32 1, %s2729_s15  }
 0x40f   : > { %s2398_s23 = scalar_lea.sflag [#allocation5], %s2397_s7 }
 0x410   : > { %p2567_p9 = pnand %p2576_p8, %p2822_p6 }
 0x412   : > { %p2568_p10 = pneg %p2567_p9 }
 0x414   : > { %2720 = dma.done.wait (%p2568_p10), %s2398_s23, 4096  }
 0x415   : > { %2722 = vsyncadd (%p2568_p10), %s2398_s23, 4294963200  ;;  %s2407_s25 = sand.u32 1, %s2498_s20  }
 0x416   : > { %s2408_s27 = scalar_lea.sflag [#allocation7], %s2407_s25 }
 0x417   : > { %2724 = dma.done.wait (%p2568_p10), %s2408_s27, 32  }
 0x418   : > { %2726 = vsyncadd (%p2568_p10), %s2408_s27, 4294967264  ;;  %p18_p5 = scmp.ge.s32.totalorder %s2803_s21, 4   ;;  %s4237_s15 = smov %s2733_s16 }
 0x419   : > { %s4238_s16 = smov %s2737_s17  ;;  %s4239_s17 = smov %s2816_s24 }
 0x41a   : > { %s4240_s18 = smov %s2803_s21  ;;  %20 = sbr.rel (!%p18_p5) target bundleno = 5 (0x5), region = 97 }
 0x41f   :  { %2422 = vsyncpa [#allocation5], 1 }
 0x420   :  { %2424 = vsyncpa [#allocation5 + $0x1], 1 }
 0x421   :  { %2425 = vsyncpa [#allocation7], 1 }
 0x422   :  { %2427 = vsyncpa [#allocation7 + $0x1], 1 }

</bundles_post_ra>
